<compile_context>
chip_gen: v7x
topology: tpu7x:2x2x1
jax: 0.10.0
libtpu: 0.0.40
codegen_flags: <defaults>
</compile_context>

<pallas_src>
import functools
import numpy as np
import jax
import jax.numpy as jnp
from jax.experimental import pallas as pl
from jax.experimental.pallas import tpu as pltpu

_BIG = 1e12   # sentinel for "no opposite pixel found"; any real d2 << _BIG
_F32 = 4


def _fused_kernel(tgt_row_ref, tgt_col_ref, coords_row_ref, coords_col_ref,
                  pred_ref, out_ref, acc_ref, *, C, ignore_index, class_w):
    """Fused brute-force EDT + softmax boundary loss for one (batch, lane-tile).

    Grid: (batch, lane_tile, candidate_chunk). The candidate-chunk axis is the
    innermost reduction axis; acc_ref (C, TP) holds, for every query pixel of
    this lane tile, the running min squared distance to any pixel of class c
    seen so far.  At the last chunk the per-class distances are finalized
    (opposite-class combine + sqrt + static class weight) and the fused
    softmax FP/FN loss partial sum for this (batch, lane-tile) is emitted.
    """
    # TODO(synk): replace the brute-force O(P^2) search with a separable
    # two-pass (Felzenszwalb/Meijster) squared-EDT for large images; an
    # all-foreground slice returns 0 here (scipy's EDT is ill-defined there).
    t = pl.program_id(2)
    num_chunks = pl.num_programs(2)

    @pl.when(t == 0)
    def _init():
        acc_ref[...] = jnp.full(acc_ref.shape, _BIG, acc_ref.dtype)

    # ---- candidate-chunk update: per-class min distance^2 (VPU) ----
    tgt_cand = jnp.clip(tgt_col_ref[0], 0, C - 1)          # (TC, 1) int32
    yq = coords_row_ref[0:1, :]                            # (1, TP) f32
    xq = coords_row_ref[1:2, :]
    yc = coords_col_ref[:, 0:1]                            # (TC, 1) f32
    xc = coords_col_ref[:, 1:2]
    dy = yc - yq
    dx = xc - xq
    d2 = dy * dy + dx * dx                                 # (TC, TP), shared by all classes
    # TODO(synk): the d2 cross term could be offloaded to the otherwise idle
    # MXU (dot of [-2y,-2x,|p|^2] x [y;x;1]) if the chunk loop stays VALU-bound.

    for c in range(C):                                     # C is small: unrolled
        in_c = tgt_cand == c                               # (TC, 1) candidate-class mask
        tile_min = jnp.min(jnp.where(in_c, d2, _BIG), axis=0, keepdims=True)  # (1, TP)
        acc_ref[c:c + 1, :] = jnp.minimum(acc_ref[c:c + 1, :], tile_min)      # in place

    # ---- epilogue: finalize distances + fused softmax / boundary loss ----
    @pl.when(t == num_chunks - 1)
    def _finalize():
        tgt_raw = tgt_row_ref[0]                           # (1, TP) int32
        tgt_q = jnp.clip(tgt_raw, 0, C - 1)
        valid = (tgt_raw != ignore_index).astype(jnp.float32)

        logits = pred_ref[0]                               # (C, TP) f32
        mx = jnp.max(logits, axis=0, keepdims=True)
        e = jnp.exp(logits - mx)
        # Epilogue runs once per lane tile (off the hot chunk loop), so an
        # exact divide here is negligible.
        denom = jnp.sum(e, axis=0, keepdims=True)

        m_rows = [acc_ref[c:c + 1, :] for c in range(C)]   # per-class min d2
        total = jnp.zeros((), jnp.float32)
        for c in range(C):
            wc = float(class_w[c])
            if wc == 0.0:
                continue                                   # excluded class (class_ids)
            other = None                                   # min over classes != c
            for c2 in range(C):
                if c2 == c:
                    continue
                other = m_rows[c2] if other is None else jnp.minimum(other, m_rows[c2])
            if other is None:                              # C == 1 degenerate case
                other = jnp.full_like(m_rows[c], _BIG)
            onehot = tgt_q == c                            # (1, TP)
            # pixel of class c -> distance to nearest non-c pixel; else -> nearest c pixel
            d2min = jnp.where(onehot, other, m_rows[c])
            dist = jnp.where(d2min < _BIG * 0.5, jnp.sqrt(d2min), 0.0)
            sm_c = e[c:c + 1, :] / denom
            # fps + fns == valid * where(onehot, 1 - softmax_c, softmax_c)
            contrib = jnp.where(onehot, 1.0 - sm_c, sm_c)
            total = total + wc * jnp.sum(contrib * valid * dist)

        # lane-dense per-(batch, lane-tile) partial sum; summed in the wrapper
        out_ref[...] = jnp.full(out_ref.shape, total, out_ref.dtype)


def _vmem_limit_bytes():
    """Generation-aware VMEM budget (v7x: 64 MiB/core; v5e/v6e: 128 MiB)."""
    cap = 64 * 1024 * 1024
    try:
        cap = int(pltpu.get_tpu_info().vmem_capacity_bytes)
    except Exception:
        pass
    return int(min(max(cap - 24 * 1024 * 1024, 16 * 1024 * 1024), 96 * 1024 * 1024))


def _pick_tiles(P, vmem_limit):
    """(TP lane tile, TC candidate chunk): divisors of P sized to the VMEM budget."""
    tp = P
    for cand in (32768, 16384, 8192, 4096, 2048, 1024, 512, 256, 128):
        if P % cand == 0 and P // cand >= 2:
            tp = cand
            break
    # ~6 simultaneously-live f32 (TC, TP) temporaries in the chunk loop must fit
    # comfortably below the limit (inputs / acc / pred blocks are tiny vs that).
    budget = max(vmem_limit // 3, 8 * 1024 * 1024)
    tc = None
    for cand in (2048, 1024, 512, 256, 128, 64, 32, 16, 8):
        if P % cand == 0 and 6 * cand * tp * _F32 <= budget:
            tc = cand
            break
    if tc is None:
        tc = 8 if P % 8 == 0 else P
    return tp, tc


def boundary_loss_tpu(pred, target, *, class_weight=None, loss_weight=1.0,
                      reduction='mean', ignore_index=255,
                      tile_p=None, tile_c=None):
    """Forward pass of mmseg BoundaryLoss (softmax + one_hot2dist + FP/FN loss)."""
    assert reduction == 'mean'
    N, C, H, W = pred.shape
    P = H * W
    pred_ncp = pred.astype(jnp.float32).reshape(N, C, P)
    target = target.astype(jnp.int32)
    tgt_row = target.reshape(N, 1, P)            # query pixels on lanes
    tgt_col = target.reshape(N, P, 1)            # candidate pixels on sublanes

    # Per-pixel (y, x) coordinates precomputed once on the host (keeps integer
    # div/mod out of the kernel).  Candidate coords are stored (P, 2) so each
    # (TC, 2) chunk block is one contiguous DMA.
    ys = (jnp.arange(P, dtype=jnp.int32) // W).astype(jnp.float32)
    xs = (jnp.arange(P, dtype=jnp.int32) % W).astype(jnp.float32)
    coords_row = jnp.stack([ys, xs], axis=0)     # (2, P)
    coords_col = jnp.stack([ys, xs], axis=1)     # (P, 2)

    # class_ids selection of the reference; excluded classes get weight 0 and
    # are skipped in the kernel epilogue (weights are static Python floats).
    if C == 1:
        class_ids = [0] if ignore_index != 0 else []
    elif C == 2:
        class_ids = [1] if ignore_index != 1 else []
    else:
        class_ids = [i for i in range(C) if i != ignore_index]
    assert len(class_ids) >= 1
    class_w = [0.0] * C
    for i in class_ids:
        class_w[i] = 1.0 if class_weight is None else float(class_weight[i])
    class_w = tuple(class_w)

    vmem_limit = _vmem_limit_bytes()
    tp_auto, tc_auto = _pick_tiles(P, vmem_limit)
    TP = int(tile_p) if tile_p is not None else tp_auto
    TC = int(tile_c) if tile_c is not None else tc_auto
    assert P % TP == 0 and (TP % 128 == 0 or TP == P), (P, TP)
    assert P % TC == 0 and (TC % 8 == 0 or TC == P), (P, TC)
    n_lane_tiles = P // TP
    num_chunks = P // TC

    partials = pl.pallas_call(
        functools.partial(_fused_kernel, C=C, ignore_index=ignore_index,
                          class_w=class_w),
        out_shape=jax.ShapeDtypeStruct((N, n_lane_tiles, 8, 128), jnp.float32),
        grid_spec=pltpu.PrefetchScalarGridSpec(
            num_scalar_prefetch=0,
            grid=(N, n_lane_tiles, num_chunks),
            in_specs=[
                pl.BlockSpec((1, 1, TP), lambda b, p, t: (b, 0, p)),   # query targets
                pl.BlockSpec((1, TC, 1), lambda b, p, t: (b, t, 0)),   # candidate targets
                pl.BlockSpec((2, TP), lambda b, p, t: (0, p)),         # query coords
                pl.BlockSpec((TC, 2), lambda b, p, t: (t, 0)),         # candidate coords
                pl.BlockSpec((1, C, TP), lambda b, p, t: (b, 0, p)),   # logits (epilogue only)
            ],
            out_specs=pl.BlockSpec((1, 1, 8, 128), lambda b, p, t: (b, p, 0, 0)),
            scratch_shapes=[pltpu.VMEM((C, TP), jnp.float32)],         # per-class min d2
        ),
        compiler_params=pltpu.CompilerParams(
            dimension_semantics=("parallel", "parallel", "arbitrary"),
            vmem_limit_bytes=vmem_limit,
        ),
    )(tgt_row, tgt_col, coords_row, coords_col, pred_ncp)

    total = jnp.sum(partials[:, :, 0, 0])
    denom = float(N * P)                          # 'mean' reduction, avg_factor=None
    return loss_weight * total / denom


def _reference(pred, target, ignore_index=255):
    """Pure numpy reference (brute-force EDT, same degenerate-case convention)."""
    pred = np.asarray(pred, np.float32)
    target = np.asarray(target)
    N, C, H, W = pred.shape
    P = H * W
    ex = np.exp(pred - pred.max(axis=1, keepdims=True))
    sm = ex / ex.sum(axis=1, keepdims=True)
    oh = np.eye(C, dtype=np.float32)[np.clip(target, 0, C - 1)]          # (N,H,W,C)
    ys, xs = np.meshgrid(np.arange(H), np.arange(W), indexing='ij')
    coords = np.stack([ys.ravel(), xs.ravel()], -1).astype(np.float32)
    d2 = ((coords[:, None, :] - coords[None, :, :]) ** 2).sum(-1)
    dist = np.zeros((N, H, W, C), np.float32)
    for b in range(N):
        for c in range(C):
            m = oh[b, :, :, c].reshape(-1) > 0.5
            if m.any() and (~m).any():
                opp = m[:, None] != m[None, :]
                cand = np.where(opp, d2, np.inf)
                dist[b, :, :, c] = np.sqrt(cand.min(axis=1)).reshape(H, W)
    valid = (target != ignore_index).astype(np.float32).reshape(N, -1)
    loss = np.zeros((N, P), np.float32)
    for c in range(C):
        p = sm[:, c].reshape(N, -1) * valid
        t = oh[..., c].reshape(N, -1) * valid
        fps = p * (1.0 - t)
        fns = (1.0 - p) * t
        loss += (fps + fns) * dist[..., c].reshape(N, -1)
    return loss.mean()


if __name__ == "__main__":
    key = jax.random.PRNGKey(0)
    k1, k2, k3 = jax.random.split(key, 3)
    N, C, H, W = 2, 4, 16, 16
    pred = jax.random.normal(k1, (N, C, H, W), jnp.float32)
    target = jax.random.randint(k2, (N, H, W), 0, C).astype(jnp.int32)
    ignore = jax.random.uniform(k3, (N, H, W)) < 0.1
    target = jnp.where(ignore, 255, target)

    # Quick sanity check of the auto tile heuristics (pure Python, no compile).
    for p_test in (256, 512 * 512, 1024 * 768):
        tp_t, tc_t = _pick_tiles(p_test, _vmem_limit_bytes())
        assert p_test % tp_t == 0 and p_test % tc_t == 0, (p_test, tp_t, tc_t)

    # Explicit small tiles so the test exercises both the lane-tile axis and
    # the multi-chunk candidate reduction: grid = (2, 2, 4).
    loss = boundary_loss_tpu(pred, target, tile_p=128, tile_c=64)
    loss = jax.block_until_ready(loss)

    ref = _reference(np.asarray(pred), np.asarray(target))
    assert abs(float(loss) - float(ref)) < 2e-3 * max(1.0, abs(float(ref))), (float(loss), float(ref))
    print("KERNEL_OK")
</pallas_src>

<mosaic_0001>
module attributes {stable_mosaic.version = 11 : i64} {
  func.func @_fused_kernel(%arg0: i32, %arg1: i32, %arg2: i32, %arg3: memref<1x1x128xi32, #tpu.memory_space<vmem>>, %arg4: memref<1x64x1xi32, #tpu.memory_space<vmem>>, %arg5: memref<2x128xf32, #tpu.memory_space<vmem>>, %arg6: memref<64x2xf32, #tpu.memory_space<vmem>>, %arg7: memref<1x4x128xf32, #tpu.memory_space<vmem>>, %arg8: memref<1x1x8x128xf32, #tpu.memory_space<vmem>>, %arg9: memref<4x128xf32, #tpu.memory_space<vmem>>) attributes {dimension_semantics = [#tpu.dimension_semantics<parallel>, #tpu.dimension_semantics<parallel>, #tpu.dimension_semantics<arbitrary>], iteration_bounds = array<i64: 2, 2, 4>, scalar_prefetch = 0 : i64, scratch_operands = 1 : i64, tpu.core_type = #tpu.core_type<tc>, window_params = [{transform_indices = @transform_0, window_bounds = array<i64: 1, 1, 128>}, {transform_indices = @transform_1, window_bounds = array<i64: 1, 64, 1>}, {transform_indices = @transform_2, window_bounds = array<i64: 2, 128>}, {transform_indices = @transform_3, window_bounds = array<i64: 64, 2>}, {transform_indices = @transform_4, window_bounds = array<i64: 1, 4, 128>}, {transform_indices = @transform_5, window_bounds = array<i64: 1, 1, 8, 128>}]} {
    %c0_i32 = arith.constant 0 : i32
    %0 = arith.cmpi eq, %arg2, %c0_i32 : i32
    %1 = arith.extui %0 : i1 to i32
    %c0_i32_0 = arith.constant 0 : i32
    %2 = arith.cmpi ne, %1, %c0_i32_0 : i32
    scf.if %2 {
      %cst_36 = arith.constant 9.99999995E+11 : f32
      %69 = vector.broadcast %cst_36 : f32 to vector<4x128xf32>
      %c0_37 = arith.constant 0 : index
      %c0_38 = arith.constant 0 : index
      %70 = vector.load %arg9[%c0_37, %c0_38] : memref<4x128xf32, #tpu.memory_space<vmem>>, vector<4x128xf32>
      tpu.vector_store %arg9[%c0_37, %c0_38], %69 {strides = array<i32>} : memref<4x128xf32, #tpu.memory_space<vmem>>, vector<4x128xf32>,
    } else {
    }
    %c0 = arith.constant 0 : index
    %c0_1 = arith.constant 0 : index
    %c0_2 = arith.constant 0 : index
    %3 = vector.load %arg4[%c0, %c0_1, %c0_2] : memref<1x64x1xi32, #tpu.memory_space<vmem>>, vector<1x64x1xi32>
    %4 = vector.shape_cast %3 : vector<1x64x1xi32> to vector<64x1xi32>
    %c0_i32_3 = arith.constant 0 : i32
    %c3_i32 = arith.constant 3 : i32
    %5 = vector.broadcast %c0_i32_3 : i32 to vector<64x1xi32>
    %6 = arith.maxsi %5, %4 : vector<64x1xi32>
    %7 = vector.broadcast %c3_i32 : i32 to vector<64x1xi32>
    %8 = arith.minsi %7, %6 : vector<64x1xi32>
    %c0_4 = arith.constant 0 : index
    %c0_5 = arith.constant 0 : index
    %9 = vector.load %arg5[%c0_4, %c0_5] : memref<2x128xf32, #tpu.memory_space<vmem>>, vector<1x128xf32>
    %c1 = arith.constant 1 : index
    %c0_6 = arith.constant 0 : index
    %10 = vector.load %arg5[%c1, %c0_6] : memref<2x128xf32, #tpu.memory_space<vmem>>, vector<1x128xf32>
    %c0_7 = arith.constant 0 : index
    %c0_8 = arith.constant 0 : index
    %11 = vector.load %arg6[%c0_7, %c0_8] : memref<64x2xf32, #tpu.memory_space<vmem>>, vector<64x1xf32>
    %c0_9 = arith.constant 0 : index
    %c1_10 = arith.constant 1 : index
    %12 = vector.load %arg6[%c0_9, %c1_10] : memref<64x2xf32, #tpu.memory_space<vmem>>, vector<64x1xf32>
    %13 = vector.broadcast %11 : vector<64x1xf32> to vector<64x128xf32>
    %14 = vector.broadcast %9 : vector<1x128xf32> to vector<64x128xf32>
    %15 = arith.subf %13, %14 : vector<64x128xf32>
    %16 = vector.broadcast %12 : vector<64x1xf32> to vector<64x128xf32>
    %17 = vector.broadcast %10 : vector<1x128xf32> to vector<64x128xf32>
    %18 = arith.subf %16, %17 : vector<64x128xf32>
    %19 = arith.mulf %15, %15 : vector<64x128xf32>
    %20 = arith.mulf %18, %18 : vector<64x128xf32>
    %21 = arith.addf %19, %20 : vector<64x128xf32>
    %c0_i32_11 = arith.constant 0 : i32
    %22 = vector.broadcast %c0_i32_11 : i32 to vector<64x1xi32>
    %23 = arith.cmpi eq, %8, %22 : vector<64x1xi32>
    %cst = arith.constant 9.99999995E+11 : f32
    %24 = vector.shape_cast %23 : vector<64x1xi1> to vector<64x1xi1>
    %25 = vector.broadcast %24 : vector<64x1xi1> to vector<64x128xi1>
    %26 = vector.broadcast %cst : f32 to vector<64x128xf32>
    %27 = arith.select %25, %21, %26 : vector<64x128xi1>, vector<64x128xf32>
    %cst_12 = arith.constant dense<0x7F800000> : vector<128xf32>
    %28 = vector.multi_reduction <minimumf>, %27, %cst_12 [0] : vector<64x128xf32> to vector<128xf32>
    %29 = vector.shape_cast %28 : vector<128xf32> to vector<1x128xf32>
    %c0_13 = arith.constant 0 : index
    %c0_14 = arith.constant 0 : index
    %30 = vector.load %arg9[%c0_13, %c0_14] : memref<4x128xf32, #tpu.memory_space<vmem>>, vector<1x128xf32>
    %31 = arith.minimumf %30, %29 : vector<1x128xf32>
    %c0_15 = arith.constant 0 : index
    %c0_16 = arith.constant 0 : index
    %32 = vector.load %arg9[%c0_15, %c0_16] : memref<4x128xf32, #tpu.memory_space<vmem>>, vector<1x128xf32>
    tpu.vector_store %arg9[%c0_15, %c0_16], %31 {strides = array<i32>} : memref<4x128xf32, #tpu.memory_space<vmem>>, vector<1x128xf32>,
    %c1_i32 = arith.constant 1 : i32
    %33 = vector.broadcast %c1_i32 : i32 to vector<64x1xi32>
    %34 = arith.cmpi eq, %8, %33 : vector<64x1xi32>
    %cst_17 = arith.constant 9.99999995E+11 : f32
    %35 = vector.shape_cast %34 : vector<64x1xi1> to vector<64x1xi1>
    %36 = vector.broadcast %35 : vector<64x1xi1> to vector<64x128xi1>
    %37 = vector.broadcast %cst_17 : f32 to vector<64x128xf32>
    %38 = arith.select %36, %21, %37 : vector<64x128xi1>, vector<64x128xf32>
    %cst_18 = arith.constant dense<0x7F800000> : vector<128xf32>
    %39 = vector.multi_reduction <minimumf>, %38, %cst_18 [0] : vector<64x128xf32> to vector<128xf32>
    %40 = vector.shape_cast %39 : vector<128xf32> to vector<1x128xf32>
    %c1_19 = arith.constant 1 : index
    %c0_20 = arith.constant 0 : index
    %41 = vector.load %arg9[%c1_19, %c0_20] : memref<4x128xf32, #tpu.memory_space<vmem>>, vector<1x128xf32>
    %42 = arith.minimumf %41, %40 : vector<1x128xf32>
    %c1_21 = arith.constant 1 : index
    %c0_22 = arith.constant 0 : index
    %43 = vector.load %arg9[%c1_21, %c0_22] : memref<4x128xf32, #tpu.memory_space<vmem>>, vector<1x128xf32>
    tpu.vector_store %arg9[%c1_21, %c0_22], %42 {strides = array<i32>} : memref<4x128xf32, #tpu.memory_space<vmem>>, vector<1x128xf32>,
    %c2_i32 = arith.constant 2 : i32
    %44 = vector.broadcast %c2_i32 : i32 to vector<64x1xi32>
    %45 = arith.cmpi eq, %8, %44 : vector<64x1xi32>
    %cst_23 = arith.constant 9.99999995E+11 : f32
    %46 = vector.shape_cast %45 : vector<64x1xi1> to vector<64x1xi1>
    %47 = vector.broadcast %46 : vector<64x1xi1> to vector<64x128xi1>
    %48 = vector.broadcast %cst_23 : f32 to vector<64x128xf32>
    %49 = arith.select %47, %21, %48 : vector<64x128xi1>, vector<64x128xf32>
    %cst_24 = arith.constant dense<0x7F800000> : vector<128xf32>
    %50 = vector.multi_reduction <minimumf>, %49, %cst_24 [0] : vector<64x128xf32> to vector<128xf32>
    %51 = vector.shape_cast %50 : vector<128xf32> to vector<1x128xf32>
    %c2 = arith.constant 2 : index
    %c0_25 = arith.constant 0 : index
    %52 = vector.load %arg9[%c2, %c0_25] : memref<4x128xf32, #tpu.memory_space<vmem>>, vector<1x128xf32>
    %53 = arith.minimumf %52, %51 : vector<1x128xf32>
    %c2_26 = arith.constant 2 : index
    %c0_27 = arith.constant 0 : index
    %54 = vector.load %arg9[%c2_26, %c0_27] : memref<4x128xf32, #tpu.memory_space<vmem>>, vector<1x128xf32>
    tpu.vector_store %arg9[%c2_26, %c0_27], %53 {strides = array<i32>} : memref<4x128xf32, #tpu.memory_space<vmem>>, vector<1x128xf32>,
    %c3_i32_28 = arith.constant 3 : i32
    %55 = vector.broadcast %c3_i32_28 : i32 to vector<64x1xi32>
    %56 = arith.cmpi eq, %8, %55 : vector<64x1xi32>
    %cst_29 = arith.constant 9.99999995E+11 : f32
    %57 = vector.shape_cast %56 : vector<64x1xi1> to vector<64x1xi1>
    %58 = vector.broadcast %57 : vector<64x1xi1> to vector<64x128xi1>
    %59 = vector.broadcast %cst_29 : f32 to vector<64x128xf32>
    %60 = arith.select %58, %21, %59 : vector<64x128xi1>, vector<64x128xf32>
    %cst_30 = arith.constant dense<0x7F800000> : vector<128xf32>
    %61 = vector.multi_reduction <minimumf>, %60, %cst_30 [0] : vector<64x128xf32> to vector<128xf32>
    %62 = vector.shape_cast %61 : vector<128xf32> to vector<1x128xf32>
    %c3 = arith.constant 3 : index
    %c0_31 = arith.constant 0 : index
    %63 = vector.load %arg9[%c3, %c0_31] : memref<4x128xf32, #tpu.memory_space<vmem>>, vector<1x128xf32>
    %64 = arith.minimumf %63, %62 : vector<1x128xf32>
    %c3_32 = arith.constant 3 : index
    %c0_33 = arith.constant 0 : index
    %65 = vector.load %arg9[%c3_32, %c0_33] : memref<4x128xf32, #tpu.memory_space<vmem>>, vector<1x128xf32>
    tpu.vector_store %arg9[%c3_32, %c0_33], %64 {strides = array<i32>} : memref<4x128xf32, #tpu.memory_space<vmem>>, vector<1x128xf32>,
    %c3_i32_34 = arith.constant 3 : i32
    %66 = arith.cmpi eq, %arg2, %c3_i32_34 : i32
    %67 = arith.extui %66 : i1 to i32
    %c0_i32_35 = arith.constant 0 : i32
    %68 = arith.cmpi ne, %67, %c0_i32_35 : i32
    scf.if %68 {
      %c0_36 = arith.constant 0 : index
      %c0_37 = arith.constant 0 : index
      %c0_38 = arith.constant 0 : index
      %69 = vector.load %arg3[%c0_36, %c0_37, %c0_38] : memref<1x1x128xi32, #tpu.memory_space<vmem>>, vector<1x1x128xi32>
      %70 = vector.shape_cast %69 : vector<1x1x128xi32> to vector<1x128xi32>
      %c0_i32_39 = arith.constant 0 : i32
      %c3_i32_40 = arith.constant 3 : i32
      %71 = vector.broadcast %c0_i32_39 : i32 to vector<1x128xi32>
      %72 = arith.maxsi %71, %70 : vector<1x128xi32>
      %73 = vector.broadcast %c3_i32_40 : i32 to vector<1x128xi32>
      %74 = arith.minsi %73, %72 : vector<1x128xi32>
      %c255_i32 = arith.constant 255 : i32
      %75 = vector.broadcast %c255_i32 : i32 to vector<1x128xi32>
      %76 = arith.cmpi ne, %70, %75 : vector<1x128xi32>
      %77 = arith.extui %76 : vector<1x128xi1> to vector<1x128xi32>
      %78 = arith.sitofp %77 : vector<1x128xi32> to vector<1x128xf32>
      %c0_41 = arith.constant 0 : index
      %c0_42 = arith.constant 0 : index
      %c0_43 = arith.constant 0 : index
      %79 = vector.load %arg7[%c0_41, %c0_42, %c0_43] : memref<1x4x128xf32, #tpu.memory_space<vmem>>, vector<1x4x128xf32>
      %80 = vector.shape_cast %79 : vector<1x4x128xf32> to vector<4x128xf32>
      %cst_44 = arith.constant dense<0xFF800000> : vector<128xf32>
      %81 = vector.multi_reduction <maximumf>, %80, %cst_44 [0] : vector<4x128xf32> to vector<128xf32>
      %82 = vector.shape_cast %81 : vector<128xf32> to vector<1x128xf32>
      %83 = vector.broadcast %82 : vector<1x128xf32> to vector<4x128xf32>
      %84 = arith.subf %80, %83 : vector<4x128xf32>
      %85 = math.exp %84 : vector<4x128xf32>
      %cst_45 = arith.constant dense<0.000000e+00> : vector<128xf32>
      %86 = vector.multi_reduction <add>, %85, %cst_45 [0] : vector<4x128xf32> to vector<128xf32>
      %87 = vector.shape_cast %86 : vector<128xf32> to vector<1x128xf32>
      %c0_46 = arith.constant 0 : index
      %c0_47 = arith.constant 0 : index
      %88 = vector.load %arg9[%c0_46, %c0_47] : memref<4x128xf32, #tpu.memory_space<vmem>>, vector<1x128xf32>
      %c1_48 = arith.constant 1 : index
      %c0_49 = arith.constant 0 : index
      %89 = vector.load %arg9[%c1_48, %c0_49] : memref<4x128xf32, #tpu.memory_space<vmem>>, vector<1x128xf32>
      %c2_50 = arith.constant 2 : index
      %c0_51 = arith.constant 0 : index
      %90 = vector.load %arg9[%c2_50, %c0_51] : memref<4x128xf32, #tpu.memory_space<vmem>>, vector<1x128xf32>
      %c3_52 = arith.constant 3 : index
      %c0_53 = arith.constant 0 : index
      %91 = vector.load %arg9[%c3_52, %c0_53] : memref<4x128xf32, #tpu.memory_space<vmem>>, vector<1x128xf32>
      %92 = arith.minimumf %89, %90 : vector<1x128xf32>
      %93 = arith.minimumf %92, %91 : vector<1x128xf32>
      %c0_i32_54 = arith.constant 0 : i32
      %94 = vector.broadcast %c0_i32_54 : i32 to vector<1x128xi32>
      %95 = arith.cmpi eq, %74, %94 : vector<1x128xi32>
      %96 = arith.select %95, %93, %88 : vector<1x128xi1>, vector<1x128xf32>
      %cst_55 = arith.constant 5.000000e+11 : f32
      %97 = vector.broadcast %cst_55 : f32 to vector<1x128xf32>
      %98 = arith.cmpf olt, %96, %97 : vector<1x128xf32>
      %99 = math.sqrt %96 : vector<1x128xf32>
      %cst_56 = arith.constant 0.000000e+00 : f32
      %100 = vector.broadcast %cst_56 : f32 to vector<1x128xf32>
      %101 = arith.select %98, %99, %100 : vector<1x128xi1>, vector<1x128xf32>
      %102 = vector.extract_strided_slice %85 {offsets = [0, 0], sizes = [1, 128], strides = [1, 1]} : vector<4x128xf32> to vector<1x128xf32>
      %103 = arith.divf %102, %87 : vector<1x128xf32>
      %cst_57 = arith.constant 1.000000e+00 : f32
      %104 = vector.broadcast %cst_57 : f32 to vector<1x128xf32>
      %105 = arith.subf %104, %103 : vector<1x128xf32>
      %106 = arith.select %95, %105, %103 : vector<1x128xi1>, vector<1x128xf32>
      %107 = arith.mulf %106, %78 : vector<1x128xf32>
      %108 = arith.mulf %107, %101 : vector<1x128xf32>
      %109 = vector.shape_cast %108 : vector<1x128xf32> to vector<1x1x128xf32>
      %cst_58 = arith.constant dense<0.000000e+00> : vector<1xf32>
      %110 = vector.multi_reduction <add>, %109, %cst_58 [1, 2] : vector<1x1x128xf32> to vector<1xf32>
      %111 = vector.shape_cast %110 : vector<1xf32> to vector<1x1x1xf32>
      %112 = vector.extract %111[0, 0, 0] : f32 from vector<1x1x1xf32>
      %cst_59 = arith.constant 1.000000e+00 : f32
      %113 = arith.mulf %cst_59, %112 : f32
      %cst_60 = arith.constant 0.000000e+00 : f32
      %114 = arith.addf %cst_60, %113 : f32
      %115 = arith.minimumf %88, %90 : vector<1x128xf32>
      %116 = arith.minimumf %115, %91 : vector<1x128xf32>
      %c1_i32_61 = arith.constant 1 : i32
      %117 = vector.broadcast %c1_i32_61 : i32 to vector<1x128xi32>
      %118 = arith.cmpi eq, %74, %117 : vector<1x128xi32>
      %119 = arith.select %118, %116, %89 : vector<1x128xi1>, vector<1x128xf32>
      %cst_62 = arith.constant 5.000000e+11 : f32
      %120 = vector.broadcast %cst_62 : f32 to vector<1x128xf32>
      %121 = arith.cmpf olt, %119, %120 : vector<1x128xf32>
      %122 = math.sqrt %119 : vector<1x128xf32>
      %cst_63 = arith.constant 0.000000e+00 : f32
      %123 = vector.broadcast %cst_63 : f32 to vector<1x128xf32>
      %124 = arith.select %121, %122, %123 : vector<1x128xi1>, vector<1x128xf32>
      %125 = vector.extract_strided_slice %85 {offsets = [1, 0], sizes = [1, 128], strides = [1, 1]} : vector<4x128xf32> to vector<1x128xf32>
      %126 = arith.divf %125, %87 : vector<1x128xf32>
      %cst_64 = arith.constant 1.000000e+00 : f32
      %127 = vector.broadcast %cst_64 : f32 to vector<1x128xf32>
      %128 = arith.subf %127, %126 : vector<1x128xf32>
      %129 = arith.select %118, %128, %126 : vector<1x128xi1>, vector<1x128xf32>
      %130 = arith.mulf %129, %78 : vector<1x128xf32>
      %131 = arith.mulf %130, %124 : vector<1x128xf32>
      %132 = vector.shape_cast %131 : vector<1x128xf32> to vector<1x1x128xf32>
      %cst_65 = arith.constant dense<0.000000e+00> : vector<1xf32>
      %133 = vector.multi_reduction <add>, %132, %cst_65 [1, 2] : vector<1x1x128xf32> to vector<1xf32>
      %134 = vector.shape_cast %133 : vector<1xf32> to vector<1x1x1xf32>
      %135 = vector.extract %134[0, 0, 0] : f32 from vector<1x1x1xf32>
      %cst_66 = arith.constant 1.000000e+00 : f32
      %136 = arith.mulf %cst_66, %135 : f32
      %137 = arith.addf %114, %136 : f32
      %138 = arith.minimumf %88, %89 : vector<1x128xf32>
      %139 = arith.minimumf %138, %91 : vector<1x128xf32>
      %c2_i32_67 = arith.constant 2 : i32
      %140 = vector.broadcast %c2_i32_67 : i32 to vector<1x128xi32>
      %141 = arith.cmpi eq, %74, %140 : vector<1x128xi32>
      %142 = arith.select %141, %139, %90 : vector<1x128xi1>, vector<1x128xf32>
      %cst_68 = arith.constant 5.000000e+11 : f32
      %143 = vector.broadcast %cst_68 : f32 to vector<1x128xf32>
      %144 = arith.cmpf olt, %142, %143 : vector<1x128xf32>
      %145 = math.sqrt %142 : vector<1x128xf32>
      %cst_69 = arith.constant 0.000000e+00 : f32
      %146 = vector.broadcast %cst_69 : f32 to vector<1x128xf32>
      %147 = arith.select %144, %145, %146 : vector<1x128xi1>, vector<1x128xf32>
      %148 = vector.extract_strided_slice %85 {offsets = [2, 0], sizes = [1, 128], strides = [1, 1]} : vector<4x128xf32> to vector<1x128xf32>
      %149 = arith.divf %148, %87 : vector<1x128xf32>
      %cst_70 = arith.constant 1.000000e+00 : f32
      %150 = vector.broadcast %cst_70 : f32 to vector<1x128xf32>
      %151 = arith.subf %150, %149 : vector<1x128xf32>
      %152 = arith.select %141, %151, %149 : vector<1x128xi1>, vector<1x128xf32>
      %153 = arith.mulf %152, %78 : vector<1x128xf32>
      %154 = arith.mulf %153, %147 : vector<1x128xf32>
      %155 = vector.shape_cast %154 : vector<1x128xf32> to vector<1x1x128xf32>
      %cst_71 = arith.constant dense<0.000000e+00> : vector<1xf32>
      %156 = vector.multi_reduction <add>, %155, %cst_71 [1, 2] : vector<1x1x128xf32> to vector<1xf32>
      %157 = vector.shape_cast %156 : vector<1xf32> to vector<1x1x1xf32>
      %158 = vector.extract %157[0, 0, 0] : f32 from vector<1x1x1xf32>
      %cst_72 = arith.constant 1.000000e+00 : f32
      %159 = arith.mulf %cst_72, %158 : f32
      %160 = arith.addf %137, %159 : f32
      %161 = arith.minimumf %88, %89 : vector<1x128xf32>
      %162 = arith.minimumf %161, %90 : vector<1x128xf32>
      %c3_i32_73 = arith.constant 3 : i32
      %163 = vector.broadcast %c3_i32_73 : i32 to vector<1x128xi32>
      %164 = arith.cmpi eq, %74, %163 : vector<1x128xi32>
      %165 = arith.select %164, %162, %91 : vector<1x128xi1>, vector<1x128xf32>
      %cst_74 = arith.constant 5.000000e+11 : f32
      %166 = vector.broadcast %cst_74 : f32 to vector<1x128xf32>
      %167 = arith.cmpf olt, %165, %166 : vector<1x128xf32>
      %168 = math.sqrt %165 : vector<1x128xf32>
      %cst_75 = arith.constant 0.000000e+00 : f32
      %169 = vector.broadcast %cst_75 : f32 to vector<1x128xf32>
      %170 = arith.select %167, %168, %169 : vector<1x128xi1>, vector<1x128xf32>
      %171 = vector.extract_strided_slice %85 {offsets = [3, 0], sizes = [1, 128], strides = [1, 1]} : vector<4x128xf32> to vector<1x128xf32>
      %172 = arith.divf %171, %87 : vector<1x128xf32>
      %cst_76 = arith.constant 1.000000e+00 : f32
      %173 = vector.broadcast %cst_76 : f32 to vector<1x128xf32>
      %174 = arith.subf %173, %172 : vector<1x128xf32>
      %175 = arith.select %164, %174, %172 : vector<1x128xi1>, vector<1x128xf32>
      %176 = arith.mulf %175, %78 : vector<1x128xf32>
      %177 = arith.mulf %176, %170 : vector<1x128xf32>
      %178 = vector.shape_cast %177 : vector<1x128xf32> to vector<1x1x128xf32>
      %cst_77 = arith.constant dense<0.000000e+00> : vector<1xf32>
      %179 = vector.multi_reduction <add>, %178, %cst_77 [1, 2] : vector<1x1x128xf32> to vector<1xf32>
      %180 = vector.shape_cast %179 : vector<1xf32> to vector<1x1x1xf32>
      %181 = vector.extract %180[0, 0, 0] : f32 from vector<1x1x1xf32>
      %cst_78 = arith.constant 1.000000e+00 : f32
      %182 = arith.mulf %cst_78, %181 : f32
      %183 = arith.addf %160, %182 : f32
      %184 = vector.broadcast %183 : f32 to vector<1x1x8x128xf32>
      %c0_79 = arith.constant 0 : index
      %c0_80 = arith.constant 0 : index
      %c0_81 = arith.constant 0 : index
      %c0_82 = arith.constant 0 : index
      %185 = vector.load %arg8[%c0_79, %c0_80, %c0_81, %c0_82] : memref<1x1x8x128xf32, #tpu.memory_space<vmem>>, vector<1x1x8x128xf32>
      tpu.vector_store %arg8[%c0_79, %c0_80, %c0_81, %c0_82], %184 {strides = array<i32>} : memref<1x1x8x128xf32, #tpu.memory_space<vmem>>, vector<1x1x8x128xf32>,
    } else {
    }
    return
  }
  func.func @transform_0(%arg0: i32, %arg1: i32, %arg2: i32) -> (i32, i32, i32) {
    %c0_i32 = arith.constant 0 : i32
    %c0_i32_0 = arith.constant 0 : i32
    return %arg0, %c0_i32, %arg1 : i32, i32, i32
  }
  func.func @transform_1(%arg0: i32, %arg1: i32, %arg2: i32) -> (i32, i32, i32) {
    %c0_i32 = arith.constant 0 : i32
    %c0_i32_0 = arith.constant 0 : i32
    return %arg0, %arg2, %c0_i32 : i32, i32, i32
  }
  func.func @transform_2(%arg0: i32, %arg1: i32, %arg2: i32) -> (i32, i32) {
    %c0_i32 = arith.constant 0 : i32
    %c0_i32_0 = arith.constant 0 : i32
    return %c0_i32, %arg1 : i32, i32
  }
  func.func @transform_3(%arg0: i32, %arg1: i32, %arg2: i32) -> (i32, i32) {
    %c0_i32 = arith.constant 0 : i32
    %c0_i32_0 = arith.constant 0 : i32
    return %arg2, %c0_i32 : i32, i32
  }
  func.func @transform_4(%arg0: i32, %arg1: i32, %arg2: i32) -> (i32, i32, i32) {
    %c0_i32 = arith.constant 0 : i32
    %c0_i32_0 = arith.constant 0 : i32
    return %arg0, %c0_i32, %arg1 : i32, i32, i32
  }
  func.func @transform_5(%arg0: i32, %arg1: i32, %arg2: i32) -> (i32, i32, i32, i32) {
    %c0_i32 = arith.constant 0 : i32
    %c0_i32_0 = arith.constant 0 : i32
    %c0_i32_1 = arith.constant 0 : i32
    return %arg0, %arg1, %c0_i32, %c0_i32_0 : i32, i32, i32, i32
  }
}

</mosaic_0001>

<bundles_post_ra>
// kernel: tpu_custom_call.1
= control target key start
LH: loop header
LB: loop body
LE: loop exit
PB: predicated region body
PF: predicated region fallthrough
CT: control target
= control target key end

     0   :  { %s1878_s0 = inlined_call_operand.vmem [shape: s32[2,1,256], index: 0, kind: input, shape index: {}]   ;;  %s1879_s1 = inlined_call_operand.vmem [shape: s32[2,256,1], index: 1, kind: input, shape index: {}]   ;;  %s1880_s2 = inlined_call_operand.vmem [shape: f32[2,256], index: 2, kind: input, shape index: {}]   ;;  %s1881_s3 = inlined_call_operand.vmem [shape: f32[256,2], index: 3, kind: input, shape index: {}]   ;;  %s1882_s4 = inlined_call_operand.vmem [shape: f32[2,4,256], index: 4, kind: input, shape index: {}]   ;;  %s1883_s5 = inlined_call_operand.hbm [shape: f32[2,2,8,128], index: 5, kind: output, shape index: {}]  }
   0x1   :  { %1896 = sst [smem:[#allocation17_spill]] %s1883_s5 }
   0x2   :  { %10 = vsyncpa [#allocation4], 0 }
   0x3   :  { %12 = vsyncpa [#allocation4 + $0x1], 0  ;;  %s1472_s18 = smov 0   ;;  %s1474_s19 = smov 0  }
   0x4   :  { %s1476_s20 = smov 0   ;;  %s1478_s21 = smov 0  }
   0x5   :  { %s1480_s22 = smov 0   ;;  %s1482_s23 = smov 0  }
   0x6   :  { %s1484_s24 = smov 0   ;;  %s1486_s25 = smov 0  }
   0x7   :  { %s1488_s26 = smov 0   ;;  %s1490_s27 = smov 0  }
   0x8 LB: > { %1897 = sst [smem:[#allocation6_spill]] %s1398_s18  ;;  %s1182_s28 = sadd.s32 4294967295, %s1434_s27   ;;  %s1434_s27 = sphi %s1490_s27, %s18_s27   ;;  %s1430_s26 = sphi %s1488_s26, %s1922_s26   ;;  %s1426_s25 = sphi %s1486_s25, %s1921_s25   ;;  %s1422_s24 = sphi %s1484_s24, %s1920_s24   ;;  %s1418_s23 = sphi %s1482_s23, %s1919_s23   ;;  %s1414_s22 = sphi %s1480_s22, %s1918_s22   ;;  %s1410_s21 = sphi %s1478_s21, %s1917_s21   ;;  %s1406_s20 = sphi %s1476_s20, %s1916_s20   ;;  %s1402_s19 = sphi %s1474_s19, %s1924_s19   ;;  %s1398_s18 = sphi %s1472_s18, %s1923_s18  }
   0x9   : > { %1898 = sst [smem:[#allocation7_spill]] %s1406_s20  ;;  %s1183_s29 = sadd.s32 4294967294, %s1434_s27  }
   0xa   : > { %1899 = sst [smem:[#allocation8_spill]] %s1422_s24  ;;  %s30_s30 = sadd.s32 1, %s1422_s24 }
   0xb   : > { %1900 = sst [smem:[#allocation9_spill]] %s1426_s25  ;;  %p31_p0 = scmp.ge.s32.totalorder %s30_s30, 4 }
   0xc   : > { %1901 = sst [smem:[#allocation10_spill]] %s1430_s26  ;;  %s33_s6 = sadd.s32 1, %s1426_s25 }
   0xd   : > { %1902 = sst [smem:[#allocation11_spill]] %s1434_s27  ;;  %s37_s7 = sadd.s32 1, %s1430_s26 }
   0xe   : > { %p192_p1 = scmp.ne.s32.totalorder %s1406_s20, %s1402_s19  ;;  %s1926_s30 = smov (%p31_p0, %s30_s30), 0 }
   0xf   : > { %1903 = sst [smem:[#allocation12_spill]] %s1926_s30  ;;  %s1928_s6 = smov (!%p31_p0, %s33_s6), %s1426_s25 }
  0x10   : > { %p193_p2 = scmp.eq.s32.totalorder %s1182_s28, 15  ;;  %p198_p3 = scmp.ne.s32.totalorder %s1402_s19, %s1398_s18 }
  0x11   : > { %p35_p4 = scmp.ge.s32.totalorder %s1928_s6, 2  ;;  %p199_p5 = scmp.eq.s32.totalorder %s1183_s29, 15 }
  0x12   : > { %p1534_p6 = por %p193_p2, %p192_p1  ;;  %p1186_p8 = scmp.ge.s32.totalorder %s1434_s27, 1 }
  0x13   : > { %s1930_s6 = smov (%p35_p4, %s1928_s6), 0  ;;  %s1932_s7 = smov (!%p35_p4, %s37_s7), %s1430_s26 }
  0x14   : > { %1905 = sst [smem:[#allocation13_spill]] %s1930_s6  ;;  %p1541_p7 = por %p199_p5, %p198_p3 }
  0x15   : > { %p39_p9 = scmp.ge.s32.totalorder %s1932_s7, 2  ;;  %p267_p10 = scmp.lt.s32.totalorder %s1434_s27, 17 }
  0x16   : > { %s1906_s9 = scalar_select %p1541_p7, 1, 0 }
  0x17   : > { %s178_s10 = ssub.s32 %s1426_s25, %s1930_s6  ;;  %s1934_s7 = smov (%p39_p9, %s1932_s7), 0 }
  0x18   : > { %1907 = sst [smem:[#allocation14_spill]] %s1906_s9  ;;  %p268_p11 = pnand %p1186_p8, %p267_p10 }
  0x19   : > { %1908 = sst [smem:[#allocation15_spill]] %s1934_s7  ;;  %s177_s11 = ssub.s32 %s1430_s26, %s1934_s7 }
  0x1a   : > { %s179_s12 = sor.u32 %s178_s10, %s177_s11  ;;  %s182_s13 = sadd.s32 1, %s1406_s20 }
  0x1b   : > { %p180_p12 = scmp.eq.s32.totalorder %s179_s12, 0  ;;  %271 = sbr.rel (%p268_p11) target bundleno = 586 (0x24a), region = 40 }
  0x1c   : > { %s1886_s15 = sand.u32 (!%p268_p11), 1, %s1402_s19   ;;  %p323_p13 = scmp.lt.s32.totalorder (!%p268_p11), %s1418_s23, 1 }
  0x1d   : > { %s1555_s14 = scalar_select %p180_p12, %s1406_s20, %s182_s13  }
  0x1e   : > { %s1561_s16 = sshll.u32 (!%p268_p11), %s1886_s15, 3  ;;  %p325_p0 = scmp.lt.s32.totalorder (!%p268_p11), %s1414_s22, 1 }
  0x1f   : > { %1909 = sst [smem:[#allocation16_spill]] %s1555_s14  ;;  %s1189_s17 = sshll.u32 (!%p268_p11), %s1410_s21, 3 }
  0x20   : > { %p333_p1 = scmp.lt.s32.totalorder (!%p268_p11), %s1189_s17, 31  ;;  %p1197_p2 = scmp.ne.s32.totalorder (!%p268_p11), %s1410_s21, 0 }
  0x22   : > { %s324_s28 = scalar_select %p323_p13, %s1418_s23, 1 }
  0x23   : > { %s326_s29 = scalar_select %p325_p0, %s1414_s22, 1 }
  0x24   : > { %s1188_s10 = sshll.u32 %s324_s28, 1  ;;  %s1190_s12 = sshll.u32 %s324_s28, 5  ;;  %v1436_v0 = vmov (!%p1197_p2), 1e+12  }
  0x25   : > { %s1567_s11 = sadd.s32 %s1188_s10, %s326_s29  ;;  %s1192_s30 = sshll.u32 %s326_s29, 1  ;;  %362 = vst [vmem:[#allocation2] sm:$0xf] (!%p1197_p2), %v1436_v0 }
  0x26   : > { %s329_s6 = scalar_lea.vmem %s1878_s0, %s1567_s11  ;;  %s1936_s17 = smov (!%p333_p1, %s1189_s17), 31 }
  0x27   : > { %s1576_s25 = scalar_lea.vmem %s1880_s2, %s1192_s30  ;;  %s1196_s24 = sshll.u32 %s1567_s11, 2 }
  0x28   : > { %s336_s14 = sadd.s32 %s1190_s12, %s1936_s17  ;;  %s1194_s20 = sshll.u32 %s1936_s17, 3 }
  0x29   : > { %s1191_s9 = sshll.u32 %s336_s14, 3  ;;  %s1582_s27 = scalar_lea.vmem %s1881_s3, %s1194_s20 }
  0x2a   : > { %s1587_s7 = scalar_lea.vmem %s1879_s1, %s1191_s9  ;;  %s1592_s26 = scalar_lea.vmem %s1882_s4, %s1196_s24 }
  0x2b   : > { %s322_s30 = scalar_lea.vmem [#allocation3], %s1561_s16  ;;  %361 = sbr.rel (%p1197_p2) target bundleno = 50 (0x32), region = 44 }
  0x32 PF: > { %v407_v1 = vld [vmem:[%s1582_s27 + $0x10] sm:$0xff]  ;;  %v405_v2 = vld [vmem:[%s1582_s27] sm:$0xff]  ;;  %v1437_v3 = vmov 1   ;;  %v1438_v4 = vmov 0   ;;  %v408_v5 = vld [vmem:[%s1582_s27 + $0x18] sm:$0xff]  ;;  %p1200_p3 = scmp.ne.s32.totalorder %s1410_s21, 3 }
  0x33   : > { %1308 = vset.pattern.permute.xlu0 %v1437_v3  ;;  %1307 = vset.pattern.permute.xlu1 %v1438_v4  ;;  %v410_v6 = vld [vmem:[%s1582_s27 + $0x28] sm:$0xff]  ;;  %v412_v7 = vld [vmem:[%s1582_s27 + $0x38] sm:$0xff]  ;;  %v363_v9 = vld [vmem:[%s1587_s7] sm:$0xff] }
  0x34   : > { %425 = vperm.xlu1 %1307, %v407_v1   ;;  %466 = vperm.xlu0 %1308, %v405_v2   ;;  %v364_v8 = vld [vmem:[%s1587_s7 + $0x8] sm:$0xff]  ;;  %vm371_vm1 = vcmp.gt.s32.totalorder %v363_v9, 0  ;;  %v367_v11 = vld [vmem:[%s1587_s7 + $0x20] sm:$0xff]  ;;  %v365_v12 = vld [vmem:[%s1587_s7 + $0x10] sm:$0xff] }
  0x35   : > { %v406_v10 = vld [vmem:[%s1582_s27 + $0x8] sm:$0xff]  ;;  %vm373_vm0 = vcmp.gt.s32.totalorder %v364_v8, 0  ;;  %v372_v14 = vsel %vm371_vm1, %v363_v9, 0  ;;  %vm379_vm2 = vcmp.gt.s32.totalorder %v367_v11, 0  ;;  %vm375_vm3 = vcmp.gt.s32.totalorder %v365_v12, 0  ;;  %v369_v15 = vld [vmem:[%s1587_s7 + $0x30] sm:$0xff] }
  0x36   : > { %v374_v13 = vsel %vm373_vm0, %v364_v8, 0  ;;  %v366_v16 = vld [vmem:[%s1587_s7 + $0x18] sm:$0xff]  ;;  %v409_v17 = vld [vmem:[%s1582_s27 + $0x20] sm:$0xff]  ;;  %vm387_vm5 = vcmp.lt.s32.totalorder %v372_v14, 3  ;;  %v380_v18 = vsel %vm379_vm2, %v367_v11, 0  ;;  %v376_v19 = vsel %vm375_vm3, %v365_v12, 0 }
  0x37   : > { %vm389_vm4 = vcmp.lt.s32.totalorder %v374_v13, 3  ;;  %vm383_vm6 = vcmp.gt.s32.totalorder %v369_v15, 0  ;;  %vm377_vm7 = vcmp.gt.s32.totalorder %v366_v16, 0  ;;  %v1613_v21 = vsel %vm387_vm5, %v372_v14, 3  ;;  %v368_v22 = vld [vmem:[%s1587_s7 + $0x28] sm:$0xff]  ;;  %v411_v23 = vld [vmem:[%s1582_s27 + $0x30] sm:$0xff] }
  0x38   : > { %430 = vperm.xlu1 %1307, %v408_v5   ;;  %478 = vperm.xlu0 %1308, %v408_v5   ;;  %v1611_v20 = vsel %vm389_vm4, %v374_v13, 3  ;;  %vm395_vm8 = vcmp.lt.s32.totalorder %v380_v18, 3  ;;  %vm391_vm9 = vcmp.lt.s32.totalorder %v376_v19, 3  ;;  %v384_v24 = vsel %vm383_vm6, %v369_v15, 0  ;;  %v370_v28 = vld [vmem:[%s1587_s7 + $0x38] sm:$0xff] }
  0x39   : > { %vm534_vm10 = vcmp.eq.s32.totalorder %v1611_v20, 0  ;;  %v378_v25 = vsel %vm377_vm7, %v366_v16, 0  ;;  %vm533_vm11 = vcmp.eq.s32.totalorder %v1613_v21, 0  ;;  %v1619_v26 = vsel %vm395_vm8, %v380_v18, 3 }
  0x3a   : > { %vm381_vm12 = vcmp.gt.s32.totalorder %v368_v22, 0  ;;  %v1621_v27 = vsel %vm391_vm9, %v376_v19, 3  ;;  %vm399_vm13 = vcmp.lt.s32.totalorder %v384_v24, 3  ;;  %v542_v29 = vsel %vm534_vm10, 1, %v1438_v4 }
  0x3b   : > { %vm393_vm14 = vcmp.lt.s32.totalorder %v378_v25, 3  ;;  %v541_v30 = vsel %vm533_vm11, 1, %v1438_v4  ;;  %vm537_vm15 = vcmp.eq.s32.totalorder %v1619_v26, 0  ;;  %v382_v31 = vsel %vm381_vm12, %v368_v22, 0 }
  0x3c   : > { %440 = vperm.xlu1 %1307, %v410_v6   ;;  %486 = vperm.xlu0 %1308, %v410_v6   ;;  %vm535_vm0 = vcmp.eq.s32.totalorder %v1621_v27, 0  ;;  %v1628_v32 = vsel %vm399_vm13, %v384_v24, 3  ;;  %vm385_vm1 = vcmp.gt.s32.totalorder %v370_v28, 0  ;;  %v1631_v33 = vsel %vm393_vm14, %v378_v25, 3 }
  0x3d   : > { %v545_v34 = vsel %vm537_vm15, 1, %v1438_v4  ;;  %vm397_vm2 = vcmp.lt.s32.totalorder %v382_v31, 3  ;;  %v543_v35 = vsel %vm535_vm0, 1, %v1438_v4  ;;  %vm539_vm3 = vcmp.eq.s32.totalorder %v1628_v32, 0 }
  0x3e   : > { %v386_v36 = vsel %vm385_vm1, %v370_v28, 0  ;;  %vm536_vm4 = vcmp.eq.s32.totalorder %v1631_v33, 0  ;;  %v1637_v37 = vsel %vm397_vm2, %v382_v31, 3  ;;  %v547_v38 = vsel %vm539_vm3, 1, %v1438_v4 }
  0x3f   : > { %vm401_vm5 = vcmp.lt.s32.totalorder %v386_v36, 3  ;;  %v544_v39 = vsel %vm536_vm4, 1, %v1438_v4  ;;  %vm605_vm6 = vcmp.eq.s32.totalorder %v1613_v21, 1  ;;  %vm538_vm7 = vcmp.eq.s32.totalorder %v1637_v37, 0 }
  0x40   : > { %450 = vperm.xlu1 %1307, %v412_v7   ;;  %494 = vperm.xlu0 %1308, %v412_v7   ;;  %v1643_v40 = vsel %vm401_vm5, %v386_v36, 3  ;;  %v613_v41 = vsel %vm605_vm6, 1, %v1438_v4  ;;  %v546_v42 = vsel %vm538_vm7, 1, %v1438_v4  ;;  %vm607_vm8 = vcmp.eq.s32.totalorder %v1621_v27, 1 }
  0x41   : > { %vm540_vm9 = vcmp.eq.s32.totalorder %v1643_v40, 0  ;;  %v615_v43 = vsel %vm607_vm8, 1, %v1438_v4  ;;  %vm609_vm10 = vcmp.eq.s32.totalorder %v1619_v26, 1  ;;  %vm606_vm11 = vcmp.eq.s32.totalorder %v1611_v20, 1 }
  0x42   : > { %v548_v44 = vsel %vm540_vm9, 1, %v1438_v4  ;;  %v617_v45 = vsel %vm609_vm10, 1, %v1438_v4  ;;  %v614_v46 = vsel %vm606_vm11, 1, %v1438_v4  ;;  %vm611_vm12 = vcmp.eq.s32.totalorder %v1628_v32, 1 }
  0x43   : > { %vm608_vm13 = vcmp.eq.s32.totalorder %v1631_v33, 1  ;;  %v619_v47 = vsel %vm611_vm12, 1, %v1438_v4  ;;  %vm677_vm14 = vcmp.eq.s32.totalorder %v1613_v21, 2  ;;  %vm610_vm15 = vcmp.eq.s32.totalorder %v1637_v37, 1 }
  0x44   : > { %1309 = vset.pattern.permute.xlu1 %v1437_v3  ;;  %1310 = vset.pattern.permute.xlu0 %v1438_v4  ;;  %v616_v48 = vsel %vm608_vm13, 1, %v1438_v4  ;;  %v685_v49 = vsel %vm677_vm14, 1, %v1438_v4  ;;  %v618_v50 = vsel %vm610_vm15, 1, %v1438_v4  ;;  %vm679_vm0 = vcmp.eq.s32.totalorder %v1621_v27, 2 }
  0x45   : > { %470 = vperm.xlu1 %1309, %v406_v10   ;;  %415 = vperm.xlu0 %1310, %v405_v2   ;;  %vm612_vm1 = vcmp.eq.s32.totalorder %v1643_v40, 1  ;;  %v687_v51 = vsel %vm679_vm0, 1, %v1438_v4  ;;  %vm681_vm2 = vcmp.eq.s32.totalorder %v1619_v26, 2  ;;  %vm678_vm3 = vcmp.eq.s32.totalorder %v1611_v20, 2 }
  0x46   : > { %v620_v52 = vsel %vm612_vm1, 1, %v1438_v4  ;;  %v689_v53 = vsel %vm681_vm2, 1, %v1438_v4  ;;  %v686_v54 = vsel %vm678_vm3, 1, %v1438_v4  ;;  %vm683_vm4 = vcmp.eq.s32.totalorder %v1628_v32, 2 }
  0x47   : > { %vm680_vm5 = vcmp.eq.s32.totalorder %v1631_v33, 2  ;;  %v691_v55 = vsel %vm683_vm4, 1, %v1438_v4  ;;  %vm749_vm6 = vcmp.eq.s32.totalorder %v1613_v21, 3  ;;  %vm682_vm7 = vcmp.eq.s32.totalorder %v1637_v37, 2  ;;  %v1199_v21 = vld [vmem:[%s1576_s25 + $0x1] ss:$0 sm:$0xff] }
  0x48   : > { %v688_v56 = vsel %vm680_vm5, 1, %v1438_v4  ;;  %v757_v57 = vsel %vm749_vm6, 1, %v1438_v4  ;;  %v690_v58 = vsel %vm682_vm7, 1, %v1438_v4  ;;  %vm751_vm8 = vcmp.eq.s32.totalorder %v1621_v27, 3 }
  0x49   : > { %474 = vperm.xlu1 %1309, %v407_v1   ;;  %420 = vperm.xlu0 %1310, %v406_v10   ;;  %vm684_vm9 = vcmp.eq.s32.totalorder %v1643_v40, 2  ;;  %v759_v59 = vsel %vm751_vm8, 1, %v1438_v4  ;;  %vm753_vm10 = vcmp.eq.s32.totalorder %v1619_v26, 3  ;;  %vm750_vm11 = vcmp.eq.s32.totalorder %v1611_v20, 3  ;;  %v1198_v20 = vld [vmem:[%s1576_s25] ss:$0 sm:$0xff] }
  0x4a   : > { %v692_v60 = vsel %vm684_vm9, 1, %v1438_v4  ;;  %v761_v61 = vsel %vm753_vm10, 1, %v1438_v4  ;;  %v758_v62 = vsel %vm750_vm11, 1, %v1438_v4  ;;  %vm755_vm12 = vcmp.eq.s32.totalorder %v1628_v32, 3 }
  0x4b   : > { %vm752_vm13 = vcmp.eq.s32.totalorder %v1631_v33, 3  ;;  %v763_v63 = vsel %vm755_vm12, 1, %v1438_v4  ;;  %vm754_vm14 = vcmp.eq.s32.totalorder %v1637_v37, 3  ;;  %vm756_vm15 = vcmp.eq.s32.totalorder %v1643_v40, 3 }
  0x4c   : > { %v760_v0 = vsel %vm752_vm13, 1, %v1438_v4  ;;  %v762_v1 = vsel %vm754_vm14, 1, %v1438_v4  ;;  %v764_v2 = vsel %vm756_vm15, 1, %v1438_v4 }
  0x4d   : > { %482 = vperm.xlu1 %1309, %v409_v17   ;;  %435 = vperm.xlu0 %1310, %v409_v17  }
  0x51   : > { %490 = vperm.xlu1 %1309, %v411_v23   ;;  %445 = vperm.xlu0 %1310, %v411_v23  }
  0x55   : > { %1311 = vset.pattern.permute.xlu1 %v1438_v4  ;;  %553 = vperm.xlu0 %1310, %v542_v29  }
  0x56   : > { %550 = vperm.xlu1 %1311, %v541_v30  }
  0x59   : > { %562 = vperm.xlu0 %1310, %v545_v34  }
  0x5a   : > { %556 = vperm.xlu1 %1311, %v543_v35  }
  0x5d   : > { %568 = vperm.xlu0 %1310, %v547_v38  }
  0x5e   : > { %559 = vperm.xlu1 %1311, %v544_v39  }
  0x61   : > { %622 = vperm.xlu0 %1310, %v613_v41  }
  0x62   : > { %565 = vperm.xlu1 %1311, %v546_v42  }
  0x65   : > { %628 = vperm.xlu0 %1310, %v615_v43  }
  0x66   : > { %571 = vperm.xlu1 %1311, %v548_v44  }
  0x69   : > { %634 = vperm.xlu0 %1310, %v617_v45  }
  0x6a   : > { %625 = vperm.xlu1 %1311, %v614_v46  }
  0x6d   : > { %640 = vperm.xlu0 %1310, %v619_v47  }
  0x6e   : > { %631 = vperm.xlu1 %1311, %v616_v48  }
  0x71   : > { %694 = vperm.xlu0 %1310, %v685_v49  }
  0x72   : > { %637 = vperm.xlu1 %1311, %v618_v50  }
  0x75   : > { %700 = vperm.xlu0 %1310, %v687_v51  }
  0x76   : > { %643 = vperm.xlu1 %1311, %v620_v52  }
  0x79   : > { %706 = vperm.xlu0 %1310, %v689_v53  }
  0x7a   : > { %697 = vperm.xlu1 %1311, %v686_v54  }
  0x7d   : > { %712 = vperm.xlu0 %1310, %v691_v55  }
  0x7e   : > { %703 = vperm.xlu1 %1311, %v688_v56  }
  0x81   : > { %766 = vperm.xlu0 %1310, %v757_v57  }
  0x82   : > { %709 = vperm.xlu1 %1311, %v690_v58  }
  0x85   : > { %772 = vperm.xlu0 %1310, %v759_v59  }
  0x86   : > { %715 = vperm.xlu1 %1311, %v692_v60  }
  0x89   : > { %778 = vperm.xlu0 %1310, %v761_v61  }
  0x8a   : > { %769 = vperm.xlu1 %1311, %v758_v62  }
  0x8d   : > { %784 = vperm.xlu0 %1310, %v763_v63  }
  0x8e   : > { %775 = vperm.xlu1 %1311, %v760_v0  }
  0x92   : > { %781 = vperm.xlu1 %1311, %v762_v1  }
  0x96   : > { %787 = vperm.xlu1 %1311, %v764_v2  }
  0xb3   : > { %v426_v3 = vpop.permute.xlu1 %425  ;;  %v467_v5 = vpop.permute.xlu0 %466 }
  0xb4   : > { %v459_v30 = vsub.f32 %v426_v3, %v1198_v20  ;;  %v501_v31 = vsub.f32 %v467_v5, %v1199_v21 }
  0xb6   : > { %v511_v48 = vmul.f32 %v459_v30, %v459_v30  ;;  %v517_v54 = vmul.f32 %v501_v31, %v501_v31 }
  0xb7   : > { %v431_v6 = vpop.permute.xlu1 %430  ;;  %v479_v7 = vpop.permute.xlu0 %478 }
  0xb8   : > { %v460_v23 = vsub.f32 %v431_v6, %v1198_v20  ;;  %v504_v24 = vsub.f32 %v479_v7, %v1199_v21 }
  0xba   : > { %v512_v32 = vmul.f32 %v460_v23, %v460_v23  ;;  %v520_v38 = vmul.f32 %v504_v24, %v504_v24 }
  0xbb   : > { %v441_v8 = vpop.permute.xlu1 %440  ;;  %v487_v9 = vpop.permute.xlu0 %486 }
  0xbc   : > { %v462_v26 = vsub.f32 %v441_v8, %v1198_v20  ;;  %v506_v27 = vsub.f32 %v487_v9, %v1199_v21  ;;  %v1697_v59 = vadd.f32 %v520_v38, %v512_v32 }
  0xbe   : > { %v514_v43 = vmul.f32 %v462_v26, %v462_v26  ;;  %v522_v44 = vmul.f32 %v506_v27, %v506_v27 }
  0xbf   : > { %v451_v10 = vpop.permute.xlu1 %450  ;;  %v495_v11 = vpop.permute.xlu0 %494 }
  0xc0   : > { %v464_v39 = vsub.f32 %v451_v10, %v1198_v20  ;;  %v508_v40 = vsub.f32 %v495_v11, %v1199_v21  ;;  %v1699_v60 = vadd.f32 %v522_v44, %v514_v43 }
  0xc2   : > { %v516_v55 = vmul.f32 %v464_v39, %v464_v39  ;;  %v524_v56 = vmul.f32 %v508_v40, %v508_v40  ;;  %v602_v39 = vld [vmem:[#allocation2] sm:$0x1] }
  0xc4   : > { %v471_v12 = vpop.permute.xlu1 %470  ;;  %v416_v13 = vpop.permute.xlu0 %415  ;;  %v1708_v3 = vadd.f32 %v524_v56, %v516_v55 }
  0xc5   : > { %v502_v33 = vsub.f32 %v471_v12, %v1199_v21  ;;  %v457_v41 = vsub.f32 %v416_v13, %v1198_v20 }
  0xc7   : > { %v518_v49 = vmul.f32 %v502_v33, %v502_v33  ;;  %v509_v57 = vmul.f32 %v457_v41, %v457_v41 }
  0xc8   : > { %v475_v14 = vpop.permute.xlu1 %474  ;;  %v421_v15 = vpop.permute.xlu0 %420 }
  0xc9   : > { %v458_v28 = vsub.f32 %v421_v15, %v1198_v20  ;;  %v503_v45 = vsub.f32 %v475_v14, %v1199_v21  ;;  %v1710_v5 = vadd.f32 %v517_v54, %v509_v57 }
  0xcb   : > { %v510_v46 = vmul.f32 %v458_v28, %v458_v28  ;;  %v519_v61 = vmul.f32 %v503_v45, %v503_v45 }
  0xcc   : > { %v483_v16 = vpop.permute.xlu1 %482  ;;  %v436_v17 = vpop.permute.xlu0 %435 }
  0xcd   : > { %v505_v34 = vsub.f32 %v483_v16, %v1199_v21  ;;  %v461_v35 = vsub.f32 %v436_v17, %v1198_v20  ;;  %v1701_v62 = vadd.f32 %v518_v49, %v510_v46  ;;  %v1712_v7 = vadd.f32 %v519_v61, %v511_v48 }
  0xcf   : > { %v521_v50 = vmul.f32 %v505_v34, %v505_v34  ;;  %v513_v51 = vmul.f32 %v461_v35, %v461_v35 }
  0xd0   : > { %v491_v18 = vpop.permute.xlu1 %490  ;;  %v446_v19 = vpop.permute.xlu0 %445 }
  0xd1   : > { %v507_v36 = vsub.f32 %v491_v18, %v1199_v21  ;;  %v463_v37 = vsub.f32 %v446_v19, %v1198_v20  ;;  %v1703_v0 = vadd.f32 %v521_v50, %v513_v51 }
  0xd3   : > { %v523_v52 = vmul.f32 %v507_v36, %v507_v36  ;;  %v515_v53 = vmul.f32 %v463_v37, %v463_v37 }
  0xd4   : > { %v554_v4 = vpop.permute.xlu0 %553 }
  0xd5   : > { %v551_v22 = vpop.permute.xlu1 %550  ;;  %vm574_vm0 = vcmp.eq.s32.totalorder %v554_v4, 1  ;;  %v1705_v1 = vadd.f32 %v523_v52, %v515_v53 }
  0xd6   : > { %vm573_vm4 = vcmp.eq.s32.totalorder %v551_v22, 1  ;;  %v582_v8 = vsel %vm574_vm0, %v1701_v62, 1e+12 }
  0xd7   : > { %v581_v12 = vsel %vm573_vm4, %v1710_v5, 1e+12 }
  0xd8   : > { %v563_v25 = vpop.permute.xlu0 %562 }
  0xd9   : > { %v557_v29 = vpop.permute.xlu1 %556  ;;  %vm577_vm1 = vcmp.eq.s32.totalorder %v563_v25, 1 }
  0xda   : > { %vm575_vm5 = vcmp.eq.s32.totalorder %v557_v29, 1  ;;  %v585_v9 = vsel %vm577_vm1, %v1703_v0, 1e+12 }
  0xdb   : > { %v583_v14 = vsel %vm575_vm5, %v1712_v7, 1e+12  ;;  %v589_v17 = vmin.f32 %v581_v12, %v585_v9 }
  0xdc   : > { %v569_v42 = vpop.permute.xlu0 %568 }
  0xdd   : > { %v560_v47 = vpop.permute.xlu1 %559  ;;  %vm579_vm2 = vcmp.eq.s32.totalorder %v569_v42, 1 }
  0xde   : > { %vm576_vm6 = vcmp.eq.s32.totalorder %v560_v47, 1  ;;  %v587_v10 = vsel %vm579_vm2, %v1705_v1, 1e+12 }
  0xdf   : > { %v584_v15 = vsel %vm576_vm6, %v1697_v59, 1e+12  ;;  %v591_v18 = vmin.f32 %v583_v14, %v587_v10 }
  0xe0   : > { %v623_v58 = vpop.permute.xlu0 %622 }
  0xe1   : > { %v566_v63 = vpop.permute.xlu1 %565  ;;  %vm645_vm12 = vcmp.eq.s32.totalorder %v623_v58, 1 }
  0xe2   : > { %vm578_vm3 = vcmp.eq.s32.totalorder %v566_v63, 1  ;;  %v653_v38 = vsel %vm645_vm12, %v1710_v5, 1e+12 }
  0xe3   : > { %v586_v2 = vsel %vm578_vm3, %v1699_v60, 1e+12 }
  0xe4   : > { %v629_v6 = vpop.permute.xlu0 %628  ;;  %v590_v13 = vmin.f32 %v582_v8, %v586_v2 }
  0xe5   : > { %v572_v11 = vpop.permute.xlu1 %571  ;;  %vm647_vm13 = vcmp.eq.s32.totalorder %v629_v6, 1 }
  0xe6   : > { %vm580_vm7 = vcmp.eq.s32.totalorder %v572_v11, 1  ;;  %v593_v21 = vmin.f32 %v589_v17, %v590_v13  ;;  %v655_v42 = vsel %vm647_vm13, %v1712_v7, 1e+12 }
  0xe7   : > { %v588_v16 = vsel %vm580_vm7, %v1708_v3, 1e+12 }
  0xe8   : > { %v592_v19 = vmin.f32 %v584_v15, %v588_v16  ;;  %v635_v4 = vpop.permute.xlu0 %634  ;;  %v674_v15 = vld [vmem:[#allocation2 + $0x1] sm:$0x1] }
  0xe9   : > { %v626_v20 = vpop.permute.xlu1 %625  ;;  %vm649_vm8 = vcmp.eq.s32.totalorder %v635_v4, 1 }
  0xea   : > { %v594_v22 = vmin.f32 %v591_v18, %v592_v19  ;;  %vm646_vm9 = vcmp.eq.s32.totalorder %v626_v20, 1  ;;  %v657_v34 = vsel %vm649_vm8, %v1703_v0, 1e+12 }
  0xeb   : > { %v654_v35 = vsel %vm646_vm9, %v1701_v62, 1e+12  ;;  %v661_v46 = vmin.f32 %v653_v38, %v657_v34 }
  0xec   : > { %v595_v23 = vmin.f32 %v593_v21, %v594_v22  ;;  %v641_v24 = vpop.permute.xlu0 %640 }
  0xed   : > { %v632_v25 = vpop.permute.xlu1 %631  ;;  %vm651_vm10 = vcmp.eq.s32.totalorder %v641_v24, 1 }
  0xee   : > { %v596_v26 = vrot.slane %v595_v23, 4  ;;  %vm648_vm14 = vcmp.eq.s32.totalorder %v632_v25, 1  ;;  %v659_v36 = vsel %vm651_vm10, %v1705_v1, 1e+12 }
  0xef   : > { %v656_v43 = vsel %vm648_vm14, %v1697_v59, 1e+12  ;;  %v663_v47 = vmin.f32 %v655_v42, %v659_v36 }
  0xf0   : > { %v597_v27 = vmin.f32 %v595_v23, %v596_v26  ;;  %v695_v28 = vpop.permute.xlu0 %694 }
  0xf1   : > { %v638_v29 = vpop.permute.xlu1 %637  ;;  %vm717_vm4 = vcmp.eq.s32.totalorder %v695_v28, 1 }
  0xf2   : > { %v598_v30 = vrot.slane %v597_v27, 2  ;;  %vm650_vm11 = vcmp.eq.s32.totalorder %v638_v29, 1  ;;  %v725_v14 = vsel %vm717_vm4, %v1710_v5, 1e+12 }
  0xf3   : > { %v658_v31 = vsel %vm650_vm11, %v1699_v60, 1e+12 }
  0xf4   : > { %v599_v32 = vmin.f32 %v597_v27, %v598_v30  ;;  %v701_v33 = vpop.permute.xlu0 %700  ;;  %v662_v41 = vmin.f32 %v654_v35, %v658_v31 }
  0xf5   : > { %v644_v37 = vpop.permute.xlu1 %643  ;;  %vm719_vm5 = vcmp.eq.s32.totalorder %v701_v33, 1 }
  0xf6   : > { %v600_v40 = vrot.slane %v599_v32, 1  ;;  %vm652_vm15 = vcmp.eq.s32.totalorder %v644_v37, 1  ;;  %v665_v52 = vmin.f32 %v661_v46, %v662_v41  ;;  %v727_v18 = vsel %vm719_vm5, %v1712_v7, 1e+12 }
  0xf7   : > { %v660_v44 = vsel %vm652_vm15, %v1708_v3, 1e+12 }
  0xf8   : > { %v601_v45 = vmin.f32 %v599_v32, %v600_v40  ;;  %v664_v48 = vmin.f32 %v656_v43, %v660_v44  ;;  %v707_v49 = vpop.permute.xlu0 %706  ;;  %v746_v43 = vld [vmem:[#allocation2 + $0x2] sm:$0x1] }
  0xf9   : > { %v698_v50 = vpop.permute.xlu1 %697  ;;  %vm721_vm0 = vcmp.eq.s32.totalorder %v707_v49, 1 }
  0xfa   : > { %v603_v51 = vmin.f32 %v602_v39, %v601_v45  ;;  %v666_v53 = vmin.f32 %v663_v47, %v664_v48  ;;  %vm718_vm1 = vcmp.eq.s32.totalorder %v698_v50, 1  ;;  %v729_v10 = vsel %vm721_vm0, %v1703_v0, 1e+12 }
  0xfb   : > { %v726_v11 = vsel %vm718_vm1, %v1701_v62, 1e+12  ;;  %v733_v21 = vmin.f32 %v725_v14, %v729_v10  ;;  %vm834_vm0 = vcmask (!%p1200_p3), 1043456  }
  0xfc   : > { %604 = vst [vmem:[#allocation2] sm:$0x1] %v603_v51  ;;  %v667_v54 = vmin.f32 %v665_v52, %v666_v53  ;;  %v713_v55 = vpop.permute.xlu0 %712 }
  0xfd   : > { %v704_v56 = vpop.permute.xlu1 %703  ;;  %vm723_vm2 = vcmp.eq.s32.totalorder %v713_v55, 1 }
  0xfe   : > { %v668_v57 = vrot.slane %v667_v54, 4  ;;  %vm720_vm6 = vcmp.eq.s32.totalorder %v704_v56, 1  ;;  %v731_v12 = vsel %vm723_vm2, %v1705_v1, 1e+12 }
  0xff   : > { %v728_v19 = vsel %vm720_vm6, %v1697_v59, 1e+12  ;;  %v735_v22 = vmin.f32 %v727_v18, %v731_v12 }
 0x100   : > { %v669_v58 = vmin.f32 %v667_v54, %v668_v57  ;;  %v767_v61 = vpop.permute.xlu0 %766  ;;  %v818_v57 = vld [vmem:[#allocation2 + $0x3] sm:$0x1] }
 0x101   : > { %v710_v63 = vpop.permute.xlu1 %709  ;;  %vm789_vm12 = vcmp.eq.s32.totalorder %v767_v61, 1 }
 0x102   : > { %v670_v2 = vrot.slane %v669_v58, 2  ;;  %vm722_vm3 = vcmp.eq.s32.totalorder %v710_v63, 1  ;;  %v797_v42 = vsel %vm789_vm12, %v1710_v5, 1e+12 }
 0x103   : > { %v730_v6 = vsel %vm722_vm3, %v1699_v60, 1e+12 }
 0x104   : > { %v671_v8 = vmin.f32 %v669_v58, %v670_v2  ;;  %v773_v9 = vpop.permute.xlu0 %772  ;;  %v734_v17 = vmin.f32 %v726_v11, %v730_v6 }
 0x105   : > { %v716_v13 = vpop.permute.xlu1 %715  ;;  %vm791_vm13 = vcmp.eq.s32.totalorder %v773_v9, 1  ;;  %v825_v9 = vld [vmem:[%s329_s6] sm:$0x1] (!%p1200_p3) }
 0x106   : > { %v672_v16 = vrot.slane %v671_v8, 1  ;;  %vm724_vm7 = vcmp.eq.s32.totalorder %v716_v13, 1  ;;  %v737_v27 = vmin.f32 %v733_v21, %v734_v17  ;;  %v799_v46 = vsel %vm791_vm13, %v1712_v7, 1e+12 }
 0x107   : > { %v732_v4 = vsel %vm724_vm7, %v1708_v3, 1e+12  ;;  %vm826_vm1 = vcmp.gt.s32.totalorder (!%p1200_p3), %v825_v9, 0 }
 0x108   : > { %v673_v20 = vmin.f32 %v671_v8, %v672_v16  ;;  %v736_v23 = vmin.f32 %v728_v19, %v732_v4  ;;  %v779_v24 = vpop.permute.xlu0 %778  ;;  %v827_v13 = vsel (!%p1200_p3), %vm826_vm1, %v825_v9, 0  ;;  %v852_v19 = vld [vmem:[#allocation2] sm:$0x1] (!%p1200_p3) }
 0x109   : > { %v770_v25 = vpop.permute.xlu1 %769  ;;  %vm793_vm8 = vcmp.eq.s32.totalorder %v779_v24, 1  ;;  %vm828_vm2 = vcmp.lt.s32.totalorder (!%p1200_p3), %v827_v13, 3 }
 0x10a   : > { %v675_v26 = vmin.f32 %v674_v15, %v673_v20  ;;  %v738_v28 = vmin.f32 %v735_v22, %v736_v23  ;;  %vm790_vm9 = vcmp.eq.s32.totalorder %v770_v25, 1  ;;  %v801_v38 = vsel %vm793_vm8, %v1703_v0, 1e+12 }
 0x10b   : > { %v798_v39 = vsel %vm790_vm9, %v1701_v62, 1e+12  ;;  %v805_v49 = vmin.f32 %v797_v42, %v801_v38  ;;  %v1753_v18 = vsel (!%p1200_p3), %vm828_vm2, %v827_v13, 3  ;;  %v1439_v38 = vmov (!%p1200_p3), 1966171168  }
 0x10c   : > { %676 = vst [vmem:[#allocation2 + $0x1] sm:$0x1] %v675_v26  ;;  %v739_v29 = vmin.f32 %v737_v27, %v738_v28  ;;  %v785_v32 = vpop.permute.xlu0 %784  ;;  %vm858_vm3 = vcmp.eq.s32.totalorder (!%p1200_p3), %v1753_v18, 0  ;;  %vm964_vm4 = vcmp.eq.s32.totalorder (!%p1200_p3), %v1753_v18, 2  ;;  %vm889_vm5 = vcmp.eq.s32.totalorder (!%p1200_p3), %v1753_v18, 1 }
 0x10d   : > { %v776_v30 = vpop.permute.xlu1 %775  ;;  %vm795_vm10 = vcmp.eq.s32.totalorder %v785_v32, 1  ;;  %vm994_vm6 = vcmp.eq.s32.totalorder (!%p1200_p3), %v1753_v18, 3  ;;  %vm830_vm8 = vcmp.ne.s32.totalorder (!%p1200_p3), %v825_v9, 255 }
 0x10e   : > { %v740_v31 = vrot.slane %v739_v29, 4  ;;  %vm792_vm14 = vcmp.eq.s32.totalorder %v776_v30, 1  ;;  %v803_v40 = vsel %vm795_vm10, %v1705_v1, 1e+12  ;;  %vm875_vm10 = vcmask (!%p1200_p3), 1040384  }
 0x10f   : > { %v807_v0 = vmin.f32 %v799_v46, %v803_v40  ;;  %v904_v40 = vlaneseq (!%p1200_p3) }
 0x110   : > { %v741_v33 = vmin.f32 %v739_v29, %v740_v31 }
 0x111   : > { %v782_v34 = vpop.permute.xlu1 %781 }
 0x112   : > { %v742_v35 = vrot.slane %v741_v33, 2  ;;  %vm794_vm11 = vcmp.eq.s32.totalorder %v782_v34, 1 }
 0x113   : > { %v802_v36 = vsel %vm794_vm11, %v1699_v60, 1e+12  ;;  %v800_v60 = vsel %vm792_vm14, %v1697_v59, 1e+12  ;;  %v833_v59 = vld [vmem:[%s1592_s26] sm:$0xf] (!%p1200_p3) }
 0x114   : > { %v743_v37 = vmin.f32 %v741_v33, %v742_v35  ;;  %v806_v45 = vmin.f32 %v798_v39, %v802_v36  ;;  %v853_v14 = vld [vmem:[#allocation2 + $0x1] sm:$0x1] (!%p1200_p3)  ;;  %v902_v39 = vunpack.c.l.s4 (!%p1200_p3), %v1439_v38 }
 0x115   : > { %v788_v41 = vpop.permute.xlu1 %787  ;;  %v962_v20 = vmin.f32 (!%p1200_p3), %v852_v19, %v853_v14 }
 0x116   : > { %v744_v44 = vrot.slane %v743_v37, 1  ;;  %vm796_vm15 = vcmp.eq.s32.totalorder %v788_v41, 1  ;;  %v809_v51 = vmin.f32 %v805_v49, %v806_v45  ;;  %v903_v42 = vunpack.c.0.s8 (!%p1200_p3), %v902_v39 }
 0x117   : > { %v804_v47 = vsel %vm796_vm15, %v1708_v3, 1e+12  ;;  %v835_v3 = vsel (!%p1200_p3), %vm834_vm0, %v833_v59, -inf }
 0x118   : > { %v745_v48 = vmin.f32 %v743_v37, %v744_v44  ;;  %v808_v50 = vmin.f32 %v800_v60, %v804_v47  ;;  %v836_v61 = vrot.slane (!%p1200_p3), %v835_v3, 4 }
 0x11a   : > { %v747_v62 = vmin.f32 %v746_v43, %v745_v48  ;;  %v810_v1 = vmin.f32 %v807_v0, %v808_v50  ;;  %v837_v63 = vmax.f32 (!%p1200_p3), %v835_v3, %v836_v61  ;;  %v905_v43 = vshrl.u32 (!%p1200_p3), %v904_v40, 7 }
 0x11b   : > { %v1440_v50 = vmov (!%p1200_p3), 0.0  }
 0x11c   : > { %748 = vst [vmem:[#allocation2 + $0x2] sm:$0x1] %v747_v62  ;;  %v811_v52 = vmin.f32 %v809_v51, %v810_v1  ;;  %v838_v2 = vrot.slane (!%p1200_p3), %v837_v63, 2  ;;  %v906_v48 = vsub.s32 (!%p1200_p3), %v903_v42, %v905_v43  ;;  %v1201_v62 = vsel (!%p1200_p3), %vm830_vm8, 1.0, %v1440_v50 }
 0x11e   : > { %v812_v5 = vrot.slane %v811_v52, 4  ;;  %v839_v6 = vmax.f32 (!%p1200_p3), %v837_v63, %v838_v2 }
 0x120   : > { %v813_v53 = vmin.f32 %v811_v52, %v812_v5  ;;  %v840_v8 = vrot.slane (!%p1200_p3), %v839_v6, 1 }
 0x122   : > { %v814_v54 = vrot.slane %v813_v53, 2  ;;  %v841_v10 = vmax.f32 (!%p1200_p3), %v839_v6, %v840_v8 }
 0x123   : > { %v854_v15 = vld [vmem:[#allocation2 + $0x2] sm:$0x1] (!%p1200_p3) }
 0x124   : > { %v815_v55 = vmin.f32 %v813_v53, %v814_v54  ;;  %v842_v11 = vsub.f32 (!%p1200_p3), %v833_v59, %v841_v10  ;;  %v856_v16 = vmin.f32 (!%p1200_p3), %v853_v14, %v854_v15  ;;  %v887_v22 = vmin.f32 (!%p1200_p3), %v852_v19, %v854_v15 }
 0x125   : > { %v993_v30 = vmin.f32 (!%p1200_p3), %v962_v20, %v854_v15 }
 0x126   : > { %v816_v56 = vrot.slane %v815_v55, 1  ;;  %824 = sbr.rel (%p1200_p3) target bundleno = 559 (0x22f), region = 48  ;;  %v843_v12 = vmul.f32 (!%p1200_p3), 1.442695, %v842_v11 }
 0x128   : > { %v817_v7 = vmin.f32 %v815_v55, %v816_v56  ;;  %1312 = vpow2.f32 (!%p1200_p3), %v843_v12 }
 0x12a   : > { %v819_v58 = vmin.f32 %v818_v57, %v817_v7 }
 0x12c   : > { %820 = vst [vmem:[#allocation2 + $0x3] sm:$0x1] %v819_v58 }
 0x132   : > { %v1313_v21 = vpop.eup %1312 }
 0x133   : > { %v855_v17 = vld [vmem:[#allocation2 + $0x3] sm:$0x1]  ;;  %v845_v23 = vsel %vm834_vm0, %v1313_v21, 0.0 }
 0x134   : > { %v857_v4 = vmin.f32 %v856_v16, %v855_v17  ;;  %v846_v24 = vrot.slane %v845_v23, 4  ;;  %v963_v26 = vmin.f32 %v962_v20, %v855_v17  ;;  %v888_v28 = vmin.f32 %v887_v22, %v855_v17 }
 0x135   : > { %v1773_v35 = vsel %vm994_vm6, %v993_v30, %v855_v17 }
 0x136   : > { %v859_v25 = vsel %vm858_vm3, %v857_v4, %v852_v19  ;;  %v847_v27 = vadd.f32 %v846_v24, %v845_v23  ;;  %v1763_v31 = vsel %vm964_vm4, %v963_v26, %v854_v15  ;;  %v1768_v33 = vsel %vm889_vm5, %v888_v28, %v853_v14 }
 0x137   : > { %1314 = vrsqrt.f32 %v859_v25  ;;  %vm863_vm7 = vcmp.eq.f32.partialorder %v859_v25, inf  ;;  %v866_v46 = vand.u32 2147483648, %v859_v25  ;;  %vm865_vm9 = vcmp.eq.f32.partialorder %v859_v25, 0.0 }
 0x138   : > { %v848_v29 = vrot.slane %v847_v27, 2  ;;  %1316 = vrsqrt.f32 %v1763_v31  ;;  %vm966_vm11 = vcmp.lt.f32.partialorder %v1763_v31, 5e+11  ;;  %vm969_vm12 = vcmp.eq.f32.partialorder %v1763_v31, inf }
 0x139   : > { %1318 = vrsqrt.f32 %v1768_v33  ;;  %vm860_vm13 = vcmp.lt.f32.partialorder %v859_v25, 5e+11  ;;  %vm894_vm14 = vcmp.eq.f32.partialorder %v1768_v33, inf  ;;  %vm971_vm15 = vcmp.eq.f32.partialorder %v1763_v31, 0.0 }
 0x13a   : > { %v849_v32 = vadd.f32 %v848_v29, %v847_v27  ;;  %1320 = vrsqrt.f32 %v1773_v35  ;;  %v972_v5 = vand.u32 2147483648, %v1763_v31  ;;  %vm896_vm0 = vcmp.eq.f32.partialorder %v1768_v33, 0.0 }
 0x13b   : > { %vm999_vm1 = vcmp.eq.f32.partialorder %v1773_v35, inf  ;;  %v897_v58 = vand.u32 2147483648, %v1768_v33  ;;  %vm1001_vm2 = vcmp.eq.f32.partialorder %v1773_v35, 0.0  ;;  %v1002_v9 = vand.u32 2147483648, %v1773_v35 }
 0x13c   : > { %v850_v34 = vrot.slane %v849_v32, 1 }
 0x13e   : > { %v851_v36 = vadd.f32 %v850_v34, %v849_v32 }
 0x140   : > { %1322 = vrcp.f32 %v851_v36 }
 0x141   : > { %v1315_v37 = vpop.eup %1314 }
 0x142   : > { %v862_v41 = vmul.f32 %v1315_v37, %v859_v25  ;;  %v1317_v44 = vpop.eup %1316 }
 0x143   : > { %v1319_v45 = vpop.eup %1318  ;;  %v968_v49 = vmul.f32 %v1317_v44, %v1763_v31 }
 0x144   : > { %v864_v60 = vsel %vm863_vm7, %v859_v25, %v862_v41  ;;  %v1321_v47 = vpop.eup %1320  ;;  %v893_v51 = vmul.f32 %v1319_v45, %v1768_v33  ;;  %vm891_vm7 = vcmp.lt.f32.partialorder %v1768_v33, 5e+11 }
 0x145   : > { %v867_v1 = vsel %vm865_vm9, %v866_v46, %v864_v60  ;;  %v998_v53 = vmul.f32 %v1321_v47, %v1773_v35  ;;  %v970_v56 = vsel %vm969_vm12, %v1763_v31, %v968_v49 }
 0x146   : > { %v868_v57 = vsel %vm860_vm13, %v867_v1, 0.0  ;;  %v895_v7 = vsel %vm894_vm14, %v1768_v33, %v893_v51  ;;  %v973_v6 = vsel %vm971_vm15, %v972_v5, %v970_v56 }
 0x147   : > { %v1000_v8 = vsel %vm999_vm1, %v1773_v35, %v998_v53  ;;  %v898_v15 = vsel %vm896_vm0, %v897_v58, %v895_v7  ;;  %v974_v20 = vsel %vm966_vm11, %v973_v6, 0.0 }
 0x148   : > { %v899_v23 = vsel %vm891_vm7, %v898_v15, 0.0 }
 0x14a   : > { %v1323_v0 = vpop.eup %1322 }
 0x14b   : > { %v870_v52 = vmul.f32 %v1323_v0, %v1313_v21  ;;  %v1003_v21 = vsel %vm1001_vm2, %v1002_v9, %v1000_v8 }
 0x14d   : > { %v871_v54 = vsub.f32 1.0, %v870_v52  ;;  %v931_v55 = vrot.slane %v870_v52, %v906_v48 }
 0x14f   : > { %v872_v59 = vsel %vm858_vm3, %v871_v54, %v870_v52  ;;  %v907_v3 = vrot.slane %v871_v54, %v906_v48  ;;  %v939_v61 = vrot.slane %v931_v55, %v906_v48  ;;  %v932_v63 = vcombine.high %v931_v55, %v931_v55 }
 0x150   : > { %v873_v2 = vmul.f32 %v1201_v62, %v872_v59  ;;  %vm996_vm3 = vcmp.lt.f32.partialorder %v1773_v35, 5e+11 }
 0x151   : > { %v915_v10 = vrot.slane %v907_v3, %v906_v48  ;;  %v977_v11 = vcombine.high %v939_v61, %v939_v61  ;;  %v908_v12 = vcombine.high %v907_v3, %v907_v3  ;;  %v946_v13 = vrot.slane %v932_v63, %v906_v48 }
 0x152   : > { %v874_v14 = vmul.f32 %v873_v2, %v868_v57  ;;  %v1004_v28 = vsel %vm996_vm3, %v1003_v21, 0.0 }
 0x153   : > { %v975_v16 = vcombine.high %v915_v10, %v915_v10  ;;  %v922_v17 = vrot.slane %v908_v12, %v906_v48  ;;  %v1007_v19 = vcombine.high %v946_v13, %v946_v13 }
 0x154   : > { %v876_v4 = vsel %vm875_vm10, %v874_v14, 0.0 }
 0x155   : > { %877 = vadd.xlane.f32.xlu0 %v876_v4  ;;  %v979_v22 = vsel %vm964_vm4, %v975_v16, %v977_v11  ;;  %v948_v24 = vsel %vm889_vm5, %v922_v17, %v946_v13  ;;  %v1005_v25 = vcombine.high %v922_v17, %v922_v17 }
 0x156   : > { %v980_v26 = vmul.f32 %v1201_v62, %v979_v22  ;;  %v949_v27 = vmul.f32 %v1201_v62, %v948_v24 }
 0x157   : > { %v1009_v29 = vsel %vm994_vm6, %v1005_v25, %v1007_v19 }
 0x158   : > { %v981_v30 = vmul.f32 %v980_v26, %v974_v20  ;;  %v950_v31 = vmul.f32 %v949_v27, %v899_v23  ;;  %v1010_v32 = vmul.f32 %v1201_v62, %v1009_v29 }
 0x15a   : > { %v982_v33 = vsel %vm875_vm10, %v981_v30, 0.0  ;;  %v951_v34 = vsel %vm875_vm10, %v950_v31, 0.0  ;;  %v1011_v35 = vmul.f32 %v1010_v32, %v1004_v28 }
 0x15b   : > { %983 = vadd.xlane.f32.xlu1 %v982_v33  ;;  %952 = vadd.xlane.f32.xlu0 %v951_v34 }
 0x15c   : > { %v1012_v36 = vsel %vm875_vm10, %v1011_v35, 0.0 }
 0x15f   : > { %1013 = vadd.xlane.f32.xlu1 %v1012_v36 }
 0x1e2   : > { %v878_v37 = vpop.xlane.xlu0 %877 }
 0x1e3   : > { %v879_v38 = vrot.slane %v878_v37, 4 }
 0x1e5   : > { %v880_v39 = vadd.f32 %v879_v38, %v878_v37 }
 0x1e7   : > { %v881_v40 = vrot.slane %v880_v39, 2 }
 0x1e8   : > { %v984_v41 = vpop.xlane.xlu1 %983  ;;  %v953_v18 = vpop.xlane.xlu0 %952 }
 0x1e9   : > { %v985_v42 = vrot.slane %v984_v41, 4  ;;  %v954_v43 = vrot.slane %v953_v18, 4  ;;  %v882_v44 = vadd.f32 %v881_v40, %v880_v39 }
 0x1eb   : > { %v986_v45 = vadd.f32 %v985_v42, %v984_v41  ;;  %v955_v46 = vadd.f32 %v954_v43, %v953_v18  ;;  %v883_v60 = vrot.slane %v882_v44, 1 }
 0x1ec   : > { %v1014_v47 = vpop.xlane.xlu1 %1013 }
 0x1ed   : > { %v987_v48 = vrot.slane %v986_v45, 2  ;;  %v956_v49 = vrot.slane %v955_v46, 2  ;;  %v1015_v0 = vrot.slane %v1014_v47, 4  ;;  %v884_v50 = vadd.f32 %v883_v60, %v882_v44 }
 0x1ef   : > { %v957_v62 = vadd.f32 %v956_v49, %v955_v46  ;;  %v1016_v51 = vadd.f32 %v1015_v0, %v1014_v47  ;;  %1207 = vpush %v884_v50  ;;  %v988_v1 = vadd.f32 %v987_v48, %v986_v45 }
 0x1f1   : > { %v1017_v52 = vrot.slane %v1016_v51, 2  ;;  %v958_v5 = vrot.slane %v957_v62, 1  ;;  %v989_v53 = vrot.slane %v988_v1, 1 }
 0x1f3   : > { %v1018_v54 = vadd.f32 %v1017_v52, %v1016_v51  ;;  %v959_v55 = vadd.f32 %v958_v5, %v957_v62  ;;  %v990_v56 = vadd.f32 %v989_v53, %v988_v1 }
 0x1f5   : > { %1209 = vpush %v959_v55  ;;  %v1019_v57 = vrot.slane %v1018_v54, 1 }
 0x1f6   : > { %1211 = vpush %v990_v56 }
 0x1f7   : > { %v1020_v7 = vadd.f32 %v1019_v57, %v1018_v54 }
 0x1f9   : > { %1213 = vpush %v1020_v7 }
 0x220   : > { %s1208_s20 = spop %1207 }
 0x226   : > { %s1210_s21 = spop %1209 }
 0x227   : > { %s961_s24 = sadd.f32 %s1210_s21, %s1208_s20  ;;  %s1212_s25 = spop %1211 }
 0x229   : > { %s992_s27 = sadd.f32 %s1212_s25, %s961_s24 }
 0x22a   : > { %s1214_s6 = spop %1213 }
 0x22b   : > { %s1022_s9 = sadd.f32 %s1214_s6, %s992_s27 }
 0x22d   : > { %v1023_v58 = vstv %s1022_s9 }
 0x22e   : > { %1024 = vst [vmem:[%s322_s30] sm:$0xff] %v1023_v58 }
 0x22f PF: > { %s1203_s14 = sshll.u32 %s1418_s23, 1  ;;  %s1041_s17 = sshll.u32 %s322_s30, 4  ;;  %s1821_s17 = int_to_ptr.vmem [resolvable:$true] %s1041_s17 }
 0x230   : > { %s1037_s15 = sadd.s32 %s1414_s22, %s1203_s14  ;;  %s1910_s28 = sld [smem:[#allocation17_spill]] }
 0x231   : > { %s1204_s11 = sshll.u32 %s1037_s15, 7  ;;  %s1911_s29 = sand.u32 1, %s1402_s19  }
 0x232   : > { %s1026_s13 = scalar_lea.sflag [#allocation4], %s1911_s29  ;;  %s1324_s26 = scalar_lea.vmem %s1821_s17, 128 }
 0x233   : > { %p1325_p4 = scmp.ne.s32.totalorder %s1821_s17, %s1324_s26  ;;  %s1441_s22 = smov [#allocation3]  }
 0x234   : > { %s1328_s23 = sshll.u32 %s1441_s22, 4  ;;  %s1329_s23 = int_to_ptr.vmem [resolvable:$false] %s1328_s23 }
 0x235   : > { %p1326_p5 = pnand %p1325_p4, %p1534_p6  ;;  %s1330_s16 = scalar_lea.vmem %s1329_s23, 256 }
 0x236   : > { %s1039_s7 = scalar_lea.hbm %s1910_s28, %s1204_s11  ;;  %p1331_p9 = scmp.lt.s32.totalorder %s1821_s17, %s1329_s23 }
 0x237   : > { %p1327_p8 = pneg %p1326_p5  ;;  %p1332_p10 = scmp.lt.s32.totalorder %s1330_s16, %s1324_s26 }
 0x239   : > { %p1333_p11 = por %p1332_p10, %p1331_p9 }
 0x23b   : > { %p1334_p12 = pnand %p1333_p11, %p1327_p8 }
 0x23d   : > { %1337 = shalt.err (!%p1334_p12)
}
 0x23e   : > { %s1338_s30 = scalar_lea.hbm %s1039_s7, 128  ;;  %s1342_s20 = scalar_lea.hbm %s1910_s28, 512 }
 0x23f   : > { %p1339_p13 = scmp.ne.s32.totalorder %s1039_s7, %s1338_s30  ;;  %p1343_p2 = scmp.lt.u32.totalorder %s1039_s7, %s1910_s28 }
 0x240   : > { %p1344_p3 = scmp.lt.u32.totalorder %s1342_s20, %s1338_s30  ;;  %p1346_p5 = scmp.lt.u32.totalorder %s1338_s30, %s1039_s7 }
 0x241   : > { %p1340_p0 = pnand %p1339_p13, %p1534_p6 }
 0x242   : > { %p1345_p4 = por %p1344_p3, %p1343_p2 }
 0x243   : > { %p1341_p1 = pneg %p1340_p0 }
 0x244   : > { %p1347_p9 = por %p1346_p5, %p1345_p4 }
 0x246   : > { %p1348_p8 = pnand %p1347_p9, %p1341_p1 }
 0x248   : > { %1351 = shalt.err (!%p1348_p8)
}
 0x249   : > { %1215 = dma.vmem_to_hbm [thread:$0]  (%p1534_p6), %s1821_s17, 128, %s1039_s7, %s1026_s13  }
 0x24a PF: > { %s1912_s25 = sld [smem:[#allocation11_spill]]  ;;  %s1913_s27 = sld [smem:[#allocation6_spill]] }
 0x250   : > { %p1221_p10 = scmp.ge.s32.totalorder %s1912_s25, 2  ;;  %s1053_s9 = sand.u32 1, %s1913_s27  }
 0x251   : > { %s1054_s14 = scalar_lea.sflag [#allocation4], %s1053_s9 }
 0x252   : > { %p1218_p11 = pnand %p1221_p10, %p1541_p7 }
 0x254   : > { %1393 = dma.done.wait (!%p1218_p11), %s1054_s14, 128  }
 0x255   : > { %1395 = vsyncadd (!%p1218_p11), %s1054_s14, 4294967168  ;;  %s18_s27 = sadd.s32 1, %s1912_s25   ;;  %s1915_s15 = sld [smem:[#allocation7_spill]] }
 0x256   : > { %p15_p12 = scmp.ge.s32.totalorder %s18_s27, 18   ;;  %s1916_s20 = sld [smem:[#allocation16_spill]] }
 0x257   : > { %s1917_s21 = sld [smem:[#allocation8_spill]]  ;;  %s1918_s22 = sld [smem:[#allocation9_spill]] }
 0x258   : > { %s1919_s23 = sld [smem:[#allocation10_spill]]  ;;  %s1920_s24 = sld [smem:[#allocation12_spill]] }
 0x259   : > { %s1921_s25 = sld [smem:[#allocation13_spill]]  ;;  %s1922_s26 = sld [smem:[#allocation15_spill]] }
 0x25a   : > { %s1923_s18 = smov %s1402_s19  ;;  %17 = sbr.rel (!%p15_p12) target bundleno = 8 (0x8), region = 95 }
 0x25b   : > { %s1924_s19 = smov %s1915_s15 }
 0x261   :  { %1059 = vsyncpa [#allocation4], 1 }
 0x262   :  { %1061 = vsyncpa [#allocation4 + $0x1], 1 }

</bundles_post_ra>
